<compile_context>
chip_gen: v5e
topology: v5e:2x2
jax: 0.10.0
libtpu: 0.0.40
codegen_flags: <defaults>
</compile_context>

<pallas_src>
import math

import jax
import jax.numpy as jnp
from jax.experimental import pallas as pl
from jax.experimental.pallas import tpu as pltpu

# ----------------------------- configuration ------------------------------- #
# Small but structurally faithful configuration of the original module
# (module defaults: num_shape=270, sample=8, rnn_dim=2048, latent_dim=128,
#  dist_class=20, rot_class=72).
NUM_SHAPE = 16
SAMPLE = 1
RNN_DIM = 128
LATENT_DIM = 32
DIST_CLASS = 8
ROT_CLASS = 8
IN_DIM = 512 * SAMPLE            # 512
UNIT_H = LATENT_DIM + RNN_DIM    # 160  (RnnUnit fc1 output width)
GRU_W = 3 * RNN_DIM              # 384  (GRU gate width)

BP = 8              # batch padded to the f32 sublane tile
OUT_W = 128         # lane width of the packed output slab (>= 2*NS + DC + RC)

# Packed-output lane offsets: acc lanes = x0 | x1 | x2 | x3 | zeros
OFF0 = 0
OFF1 = NUM_SHAPE
OFF2 = 2 * NUM_SHAPE
OFF3 = 2 * NUM_SHAPE + DIST_CLASS
assert OFF3 + ROT_CLASS <= OUT_W
assert OUT_W == RNN_DIM          # acc lanes feed the (OUT_W, UNIT_H) split-K block

HEAD_OFF = (OFF1, OFF2, OFF3)
HEAD_NC = (NUM_SHAPE, DIST_CLASS, ROT_CLASS)

# ---- w128 slab: lane width 128, rows stacked (all offsets sublane-aligned) ---
R_FC1 = 0
R_FC2 = R_FC1 + IN_DIM                      # 512
R_FCR1 = R_FC2 + RNN_DIM                    # 640


def R_UFC2(k):
    return R_FCR1 + RNN_DIM + k * (2 * RNN_DIM)


def R_UFC3(k):
    return R_UFC2(k) + RNN_DIM


W128_ROWS = R_UFC3(2) + RNN_DIM             # 1536

# ---- w384 slab: lane width 384 (GRU W_ih^T) ----
R_RNN1 = 0


def R_URNN(k):
    return RNN_DIM + k * UNIT_H             # 128, 288, 448 (multiples of 16)


W384_ROWS = R_URNN(2) + UNIT_H              # 608

# ---- w160 slab: lane width 160 (unit fc1 split-K blocks) ----


def R_UACC(k):                              # acc-part: (OUT_W, UNIT_H), zero rows mask lanes
    return k * OUT_W


def R_UENC(k):                              # encode-part: (RNN_DIM, UNIT_H)
    return 3 * OUT_W + k * RNN_DIM


W160_ROWS = R_UENC(2) + RNN_DIM             # 768

# ---- bias slab: lane width 384, one bias per row (zero padded) ----
B_FC1, B_RNN1_BIH, B_RNN1_BHN, B_FC2, B_OUT = 0, 1, 2, 3, 4


def B_UFC1(k):
    return 5 + 4 * k


def B_UBIH(k):
    return 6 + 4 * k


def B_UBHN(k):
    return 7 + 4 * k


def B_UFC2(k):
    return 8 + 4 * k


BIAS_ROWS = ((B_UFC2(2) + 1 + 7) // 8) * 8  # 17 -> 24

VMEM_SPEC = pl.BlockSpec(memory_space=pltpu.MemorySpace.VMEM)


# ------------------------------ fused kernel ------------------------------- #

def _decoder_kernel(x_ref, w128_ref, w384_ref, w160_ref, b_ref, o_ref):
    f32, bf16 = jnp.float32, jnp.bfloat16
    Bsl = b_ref[...]                        # (BIAS_ROWS, 384) f32, loaded once

    def bias(row, w):
        return Bsl[row:row + 1, :w]         # (1, w) f32

    def dotw(a, w):                         # bf16 MXU matmul, f32 accumulation
        return jnp.dot(a.astype(bf16), w, preferred_element_type=f32)

    def gru_zero(x, w_ih_t, b_ih, b_hn):
        # Single GRU step, zero initial hidden state (W_hh contributes 0);
        # b_hh's r/z slices are already folded into b_ih at pack time.
        gi = dotw(x, w_ih_t) + b_ih
        r = jax.nn.sigmoid(gi[:, 0:RNN_DIM])
        z = jax.nn.sigmoid(gi[:, RNN_DIM:2 * RNN_DIM])
        n = jnp.tanh(gi[:, 2 * RNN_DIM:3 * RNN_DIM] + r * b_hn)
        return (1.0 - z) * n

    x = x_ref[...]

    # ---- trunk: fc1 -> (hoisted enc projections) -> GRU -> fc2 -> fcR1 ---- #
    encode = jnp.maximum(
        dotw(x, w128_ref[R_FC1:R_FC1 + IN_DIM, :]) + bias(B_FC1, RNN_DIM), 0.0)

    # Hoisted per-unit encode->fc1 projections (+ fc1 bias folded in).  They
    # depend only on `encode`, so they are off the serial acc-dependent chain.
    enc_p = [
        dotw(encode, w160_ref[R_UENC(k):R_UENC(k) + RNN_DIM, :])
        + bias(B_UFC1(k), UNIT_H)
        for k in range(3)
    ]

    h = gru_zero(encode, w384_ref[R_RNN1:R_RNN1 + RNN_DIM, :],
                 bias(B_RNN1_BIH, GRU_W), bias(B_RNN1_BHN, RNN_DIM))
    h = jnp.maximum(
        dotw(h, w128_ref[R_FC2:R_FC2 + RNN_DIM, :]) + bias(B_FC2, RNN_DIM), 0.0)

    # acc: lane-packed output slab; all four head biases folded in up-front.
    acc = dotw(h, w128_ref[R_FCR1:R_FCR1 + RNN_DIM, :]) + bias(B_OUT, OUT_W)

    # ---- the three RnnUnit heads (split-K over the packed acc slab) ---- #
    for k in range(3):
        g = jnp.maximum(
            enc_p[k] + dotw(acc, w160_ref[R_UACC(k):R_UACC(k) + OUT_W, :]), 0.0)
        g = gru_zero(g, w384_ref[R_URNN(k):R_URNN(k) + UNIT_H, :],
                     bias(B_UBIH(k), GRU_W), bias(B_UBHN(k), RNN_DIM))
        g = jnp.maximum(
            dotw(g, w128_ref[R_UFC2(k):R_UFC2(k) + RNN_DIM, :])
            + bias(B_UFC2(k), RNN_DIM), 0.0)
        acc = acc + dotw(g, w128_ref[R_UFC3(k):R_UFC3(k) + RNN_DIM, :])

    o_ref[...] = acc.astype(o_ref.dtype)    # single unmasked (8, 128) store


def decoder_forward(packed, x):
    """Whole Decoder forward in one fused Pallas kernel."""
    b = x.shape[0]
    assert b <= BP
    xp = jnp.pad(x, ((0, BP - b), (0, 0))) if b < BP else x
    out = pl.pallas_call(
        _decoder_kernel,
        out_shape=jax.ShapeDtypeStruct((BP, OUT_W), jnp.float32),
        in_specs=[VMEM_SPEC] * 5,
        out_specs=VMEM_SPEC,
    )(xp, packed["w128"], packed["w384"], packed["w160"], packed["bias"])
    x0 = out[:b, OFF0:OFF0 + NUM_SHAPE]
    x1 = out[:b, OFF1:OFF1 + NUM_SHAPE]
    x2 = out[:b, OFF2:OFF2 + DIST_CLASS]
    x3 = out[:b, OFF3:OFF3 + ROT_CLASS]
    return x0, x1, x2, x3


# --------------------- parameters (PyTorch layout) -------------------------- #

def _uniform(key, shape, bound):
    return jax.random.uniform(key, shape, jnp.float32, -bound, bound)


def init_linear(key, out_dim, in_dim):
    kw, kb = jax.random.split(key)
    bound = 1.0 / math.sqrt(in_dim)
    return {"w": _uniform(kw, (out_dim, in_dim), bound),
            "b": _uniform(kb, (out_dim,), bound)}


def init_gru(key, in_dim, hidden):
    # nn.GRU weight_hh is a parameter of the torch module, but with seq_len==1
    # and h0==0 it is multiplied by zero in this forward pass -> not needed.
    k1, k2, k3 = jax.random.split(key, 3)
    bound = 1.0 / math.sqrt(hidden)
    return {"w_ih": _uniform(k1, (3 * hidden, in_dim), bound),
            "b_ih": _uniform(k2, (3 * hidden,), bound),
            "b_hh": _uniform(k3, (3 * hidden,), bound)}


def init_rnn_unit(key, input_dim, num_class):
    k1, k2, k3, k4 = jax.random.split(key, 4)
    return {"fc1": init_linear(k1, LATENT_DIM + RNN_DIM, input_dim),
            "rnn": init_gru(k2, RNN_DIM + LATENT_DIM, RNN_DIM),
            "fc2": init_linear(k3, RNN_DIM, RNN_DIM),
            "fc3": init_linear(k4, num_class, RNN_DIM)}


def init_decoder(key):
    ks = jax.random.split(key, 7)
    return {
        "fc1": init_linear(ks[0], RNN_DIM, IN_DIM),
        "rnn1": init_gru(ks[1], RNN_DIM, RNN_DIM),
        "fc2": init_linear(ks[2], RNN_DIM, RNN_DIM),
        "fcR1": init_linear(ks[3], NUM_SHAPE, RNN_DIM),
        "decoder1": init_rnn_unit(ks[4], NUM_SHAPE + RNN_DIM, NUM_SHAPE),
        "decoder2": init_rnn_unit(ks[5], 2 * NUM_SHAPE + RNN_DIM, DIST_CLASS),
        "decoder3": init_rnn_unit(ks[6], 2 * NUM_SHAPE + RNN_DIM + DIST_CLASS,
                                  ROT_CLASS),
    }


# --------------------- one-time layout transform ---------------------------- #

def pack_params(lg):
    """Pack every parameter into 3 bf16 weight slabs + 1 f32 bias slab (4 DMAs).

    Linear weights are transposed to (K, N); the four head weights/biases are
    zero-padded into the lane-packed (·, OUT_W) output layout; each RnnUnit's
    fc1 weight is split into an encode block and a packed-acc block (zero rows
    mask lanes that are not inputs of that head); GRU b_hh r/z slices are
    folded into b_ih.  Runs once, outside the jitted forward."""
    f32 = jnp.float32
    units = [lg["decoder1"], lg["decoder2"], lg["decoder3"]]

    w128 = jnp.zeros((W128_ROWS, RNN_DIM), f32)
    w128 = w128.at[R_FC1:R_FC1 + IN_DIM, :].set(lg["fc1"]["w"].T)
    w128 = w128.at[R_FC2:R_FC2 + RNN_DIM, :].set(lg["fc2"]["w"].T)
    w128 = w128.at[R_FCR1:R_FCR1 + RNN_DIM,
                   OFF0:OFF0 + NUM_SHAPE].set(lg["fcR1"]["w"].T)
    for k, u in enumerate(units):
        w128 = w128.at[R_UFC2(k):R_UFC2(k) + RNN_DIM, :].set(u["fc2"]["w"].T)
        w128 = w128.at[R_UFC3(k):R_UFC3(k) + RNN_DIM,
                       HEAD_OFF[k]:HEAD_OFF[k] + HEAD_NC[k]].set(u["fc3"]["w"].T)

    w384 = jnp.zeros((W384_ROWS, GRU_W), f32)
    w384 = w384.at[R_RNN1:R_RNN1 + RNN_DIM, :].set(lg["rnn1"]["w_ih"].T)
    for k, u in enumerate(units):
        w384 = w384.at[R_URNN(k):R_URNN(k) + UNIT_H, :].set(u["rnn"]["w_ih"].T)

    w160 = jnp.zeros((W160_ROWS, UNIT_H), f32)
    for k, u in enumerate(units):
        w = u["fc1"]["w"]                 # (UNIT_H, RNN_DIM + extra_k)
        w_enc = w[:, :RNN_DIM].T          # (RNN_DIM, UNIT_H)
        w_acc = w[:, RNN_DIM:].T          # (extra_k, UNIT_H); acc lanes [0:extra_k)
        w160 = w160.at[R_UENC(k):R_UENC(k) + RNN_DIM, :].set(w_enc)
        w160 = w160.at[R_UACC(k):R_UACC(k) + w_acc.shape[0], :].set(w_acc)

    def fold_gru_bias(g):
        b_ih = g["b_ih"].at[:2 * RNN_DIM].add(g["b_hh"][:2 * RNN_DIM])
        return b_ih, g["b_hh"][2 * RNN_DIM:]

    bias = jnp.zeros((BIAS_ROWS, GRU_W), f32)
    bias = bias.at[B_FC1, :RNN_DIM].set(lg["fc1"]["b"])
    b_ih1, b_hn1 = fold_gru_bias(lg["rnn1"])
    bias = bias.at[B_RNN1_BIH, :].set(b_ih1)
    bias = bias.at[B_RNN1_BHN, :RNN_DIM].set(b_hn1)
    bias = bias.at[B_FC2, :RNN_DIM].set(lg["fc2"]["b"])

    out_b = jnp.zeros((OUT_W,), f32).at[OFF0:OFF0 + NUM_SHAPE].set(lg["fcR1"]["b"])
    for k, u in enumerate(units):
        out_b = out_b.at[HEAD_OFF[k]:HEAD_OFF[k] + HEAD_NC[k]].set(u["fc3"]["b"])
    bias = bias.at[B_OUT, :OUT_W].set(out_b)

    for k, u in enumerate(units):
        bias = bias.at[B_UFC1(k), :UNIT_H].set(u["fc1"]["b"])
        ubih, ubhn = fold_gru_bias(u["rnn"])
        bias = bias.at[B_UBIH(k), :].set(ubih)
        bias = bias.at[B_UBHN(k), :RNN_DIM].set(ubhn)
        bias = bias.at[B_UFC2(k), :RNN_DIM].set(u["fc2"]["b"])

    return {"w128": w128.astype(jnp.bfloat16),
            "w384": w384.astype(jnp.bfloat16),
            "w160": w160.astype(jnp.bfloat16),
            "bias": bias}


# ------------------------- pure-JAX references ------------------------------ #

def _ref_dot_f32(x, w):
    return jnp.dot(x, w, precision=jax.lax.Precision.HIGHEST)


def _ref_dot_bf16(x, w):
    # Same numerics as the kernel: bf16 operands, f32 accumulation.
    return jnp.dot(x.astype(jnp.bfloat16), w.astype(jnp.bfloat16),
                   preferred_element_type=jnp.float32)


def _linear_ref(l, x, dot, relu=False):
    y = dot(x, l["w"].T) + l["b"]
    return jnp.maximum(y, 0.0) if relu else y


def _gru_ref(g, x, dot):
    gi = dot(x, g["w_ih"].T) + g["b_ih"]
    h = RNN_DIM
    r = jax.nn.sigmoid(gi[:, :h] + g["b_hh"][:h])
    z = jax.nn.sigmoid(gi[:, h:2 * h] + g["b_hh"][h:2 * h])
    n = jnp.tanh(gi[:, 2 * h:] + r * g["b_hh"][2 * h:])
    return (1.0 - z) * n


def _rnn_unit_ref(u, x, dot):
    h = _linear_ref(u["fc1"], x, dot, relu=True)
    h = _gru_ref(u["rnn"], h, dot)
    h = _linear_ref(u["fc2"], h, dot, relu=True)
    return _linear_ref(u["fc3"], h, dot)


def decoder_reference(lg, x, dot):
    encode = _linear_ref(lg["fc1"], x, dot, relu=True)
    h = _gru_ref(lg["rnn1"], encode, dot)
    h = _linear_ref(lg["fc2"], h, dot, relu=True)
    x0 = _linear_ref(lg["fcR1"], h, dot)
    x1 = _rnn_unit_ref(lg["decoder1"], jnp.concatenate([encode, x0], axis=1), dot)
    x2 = _rnn_unit_ref(lg["decoder2"], jnp.concatenate([encode, x0, x1], axis=1), dot)
    x3 = _rnn_unit_ref(lg["decoder3"],
                       jnp.concatenate([encode, x0, x1, x2], axis=1), dot)
    return x0, x1, x2, x3


# ---------------------------------- main ------------------------------------ #

if __name__ == "__main__":
    B = 2
    key = jax.random.PRNGKey(0)
    kp, kx = jax.random.split(key)

    logical = init_decoder(kp)          # PyTorch-layout parameters
    packed = pack_params(logical)       # kernel slabs, computed once
    x = jax.random.normal(kx, (B, IN_DIM), jnp.float32)

    fwd = jax.jit(decoder_forward)
    outs = fwd(packed, x)
    jax.block_until_ready(outs)
    x0, x1, x2, x3 = outs

    assert x0.shape == (B, NUM_SHAPE)
    assert x1.shape == (B, NUM_SHAPE)
    assert x2.shape == (B, DIST_CLASS)
    assert x3.shape == (B, ROT_CLASS)

    # Strict check against a reference with the SAME numerics (bf16 weights &
    # matmul operands, f32 accumulation/elementwise).
    refs_q = decoder_reference(logical, x, _ref_dot_bf16)
    # Looser semantic check against the exact f32 PyTorch-faithful reference
    # (the only difference is bf16 weight/operand rounding on the MXU path).
    refs_f = decoder_reference(logical, x, _ref_dot_f32)

    for got, rq, rf in zip(outs, refs_q, refs_f):
        assert bool(jnp.all(jnp.isfinite(got)))
        assert bool(jnp.allclose(got, rq, atol=5e-3, rtol=5e-3)), \
            float(jnp.max(jnp.abs(got - rq)))
        assert bool(jnp.allclose(got, rf, atol=5e-2, rtol=5e-2)), \
            float(jnp.max(jnp.abs(got - rf)))

    print("KERNEL_OK")
</pallas_src>

<mosaic_0001>
module attributes {stable_mosaic.version = 11 : i64} {
  func.func @_decoder_kernel(%arg0: memref<8x512xf32, #tpu.memory_space<vmem>>, %arg1: memref<1536x128xbf16, #tpu.memory_space<vmem>>, %arg2: memref<608x384xbf16, #tpu.memory_space<vmem>>, %arg3: memref<768x160xbf16, #tpu.memory_space<vmem>>, %arg4: memref<24x384xf32, #tpu.memory_space<vmem>>, %arg5: memref<8x128xf32, #tpu.memory_space<vmem>>) attributes {dimension_semantics = [], scalar_prefetch = 0 : i64, scratch_operands = 0 : i64, tpu.core_type = #tpu.core_type<tc>} {
    %c0 = arith.constant 0 : index
    %c0_0 = arith.constant 0 : index
    %0 = vector.load %arg4[%c0, %c0_0] : memref<24x384xf32, #tpu.memory_space<vmem>>, vector<24x384xf32>
    %c0_1 = arith.constant 0 : index
    %c0_2 = arith.constant 0 : index
    %1 = vector.load %arg0[%c0_1, %c0_2] : memref<8x512xf32, #tpu.memory_space<vmem>>, vector<8x512xf32>
    %c0_3 = arith.constant 0 : index
    %c0_4 = arith.constant 0 : index
    %2 = vector.load %arg1[%c0_3, %c0_4] : memref<1536x128xbf16, #tpu.memory_space<vmem>>, vector<512x128xbf16>
    %3 = arith.truncf %1 : vector<8x512xf32> to vector<8x512xbf16>
    %cst = arith.constant dense<0.000000e+00> : vector<8x128xf32>
    %4 = tpu.matmul %3, %2, %cst {dimension_numbers = #tpu.dot_dimension_numbers<[1], [0], [0], [1], [0, 0, 1, 1], [], []>} : vector<8x512xbf16>, vector<512x128xbf16>, vector<8x128xf32> -> vector<8x128xf32>
    %5 = vector.extract_strided_slice %0 {offsets = [0, 0], sizes = [1, 128], strides = [1, 1]} : vector<24x384xf32> to vector<1x128xf32>
    %6 = vector.broadcast %5 : vector<1x128xf32> to vector<8x128xf32>
    %7 = arith.addf %4, %6 : vector<8x128xf32>
    %cst_5 = arith.constant 0.000000e+00 : f32
    %8 = vector.broadcast %cst_5 : f32 to vector<8x128xf32>
    %9 = arith.maximumf %7, %8 : vector<8x128xf32>
    %c384 = arith.constant 384 : index
    %c0_6 = arith.constant 0 : index
    %10 = vector.load %arg3[%c384, %c0_6] : memref<768x160xbf16, #tpu.memory_space<vmem>>, vector<128x160xbf16>
    %11 = arith.truncf %9 : vector<8x128xf32> to vector<8x128xbf16>
    %cst_7 = arith.constant dense<0.000000e+00> : vector<8x160xf32>
    %12 = tpu.matmul %11, %10, %cst_7 {dimension_numbers = #tpu.dot_dimension_numbers<[1], [0], [0], [1], [0, 0, 1, 1], [], []>} : vector<8x128xbf16>, vector<128x160xbf16>, vector<8x160xf32> -> vector<8x160xf32>
    %13 = vector.extract_strided_slice %0 {offsets = [5, 0], sizes = [1, 160], strides = [1, 1]} : vector<24x384xf32> to vector<1x160xf32>
    %14 = vector.broadcast %13 : vector<1x160xf32> to vector<8x160xf32>
    %15 = arith.addf %12, %14 : vector<8x160xf32>
    %c512 = arith.constant 512 : index
    %c0_8 = arith.constant 0 : index
    %16 = vector.load %arg3[%c512, %c0_8] : memref<768x160xbf16, #tpu.memory_space<vmem>>, vector<128x160xbf16>
    %17 = arith.truncf %9 : vector<8x128xf32> to vector<8x128xbf16>
    %cst_9 = arith.constant dense<0.000000e+00> : vector<8x160xf32>
    %18 = tpu.matmul %17, %16, %cst_9 {dimension_numbers = #tpu.dot_dimension_numbers<[1], [0], [0], [1], [0, 0, 1, 1], [], []>} : vector<8x128xbf16>, vector<128x160xbf16>, vector<8x160xf32> -> vector<8x160xf32>
    %19 = vector.extract_strided_slice %0 {offsets = [9, 0], sizes = [1, 160], strides = [1, 1]} : vector<24x384xf32> to vector<1x160xf32>
    %20 = vector.broadcast %19 : vector<1x160xf32> to vector<8x160xf32>
    %21 = arith.addf %18, %20 : vector<8x160xf32>
    %c640 = arith.constant 640 : index
    %c0_10 = arith.constant 0 : index
    %22 = vector.load %arg3[%c640, %c0_10] : memref<768x160xbf16, #tpu.memory_space<vmem>>, vector<128x160xbf16>
    %23 = arith.truncf %9 : vector<8x128xf32> to vector<8x128xbf16>
    %cst_11 = arith.constant dense<0.000000e+00> : vector<8x160xf32>
    %24 = tpu.matmul %23, %22, %cst_11 {dimension_numbers = #tpu.dot_dimension_numbers<[1], [0], [0], [1], [0, 0, 1, 1], [], []>} : vector<8x128xbf16>, vector<128x160xbf16>, vector<8x160xf32> -> vector<8x160xf32>
    %25 = vector.extract_strided_slice %0 {offsets = [13, 0], sizes = [1, 160], strides = [1, 1]} : vector<24x384xf32> to vector<1x160xf32>
    %26 = vector.broadcast %25 : vector<1x160xf32> to vector<8x160xf32>
    %27 = arith.addf %24, %26 : vector<8x160xf32>
    %c0_12 = arith.constant 0 : index
    %c0_13 = arith.constant 0 : index
    %28 = vector.load %arg2[%c0_12, %c0_13] : memref<608x384xbf16, #tpu.memory_space<vmem>>, vector<128x384xbf16>
    %29 = vector.extract_strided_slice %0 {offsets = [1, 0], sizes = [1, 384], strides = [1, 1]} : vector<24x384xf32> to vector<1x384xf32>
    %30 = vector.extract_strided_slice %0 {offsets = [2, 0], sizes = [1, 128], strides = [1, 1]} : vector<24x384xf32> to vector<1x128xf32>
    %31 = arith.truncf %9 : vector<8x128xf32> to vector<8x128xbf16>
    %cst_14 = arith.constant dense<0.000000e+00> : vector<8x384xf32>
    %32 = tpu.matmul %31, %28, %cst_14 {dimension_numbers = #tpu.dot_dimension_numbers<[1], [0], [0], [1], [0, 0, 1, 1], [], []>} : vector<8x128xbf16>, vector<128x384xbf16>, vector<8x384xf32> -> vector<8x384xf32>
    %33 = vector.broadcast %29 : vector<1x384xf32> to vector<8x384xf32>
    %34 = arith.addf %32, %33 : vector<8x384xf32>
    %35 = vector.extract_strided_slice %34 {offsets = [0, 0], sizes = [8, 128], strides = [1, 1]} : vector<8x384xf32> to vector<8x128xf32>
    %36 = arith.negf %35 : vector<8x128xf32>
    %37 = math.exp %36 : vector<8x128xf32>
    %cst_15 = arith.constant 1.000000e+00 : f32
    %38 = vector.broadcast %cst_15 : f32 to vector<8x128xf32>
    %39 = arith.addf %38, %37 : vector<8x128xf32>
    %40 = arith.divf %38, %39 : vector<8x128xf32>
    %41 = vector.extract_strided_slice %34 {offsets = [0, 128], sizes = [8, 128], strides = [1, 1]} : vector<8x384xf32> to vector<8x128xf32>
    %42 = arith.negf %41 : vector<8x128xf32>
    %43 = math.exp %42 : vector<8x128xf32>
    %cst_16 = arith.constant 1.000000e+00 : f32
    %44 = vector.broadcast %cst_16 : f32 to vector<8x128xf32>
    %45 = arith.addf %44, %43 : vector<8x128xf32>
    %46 = arith.divf %44, %45 : vector<8x128xf32>
    %47 = vector.extract_strided_slice %34 {offsets = [0, 256], sizes = [8, 128], strides = [1, 1]} : vector<8x384xf32> to vector<8x128xf32>
    %48 = vector.broadcast %30 : vector<1x128xf32> to vector<8x128xf32>
    %49 = arith.mulf %40, %48 : vector<8x128xf32>
    %50 = arith.addf %47, %49 : vector<8x128xf32>
    %51 = math.tanh %50 : vector<8x128xf32>
    %cst_17 = arith.constant 1.000000e+00 : f32
    %52 = vector.broadcast %cst_17 : f32 to vector<8x128xf32>
    %53 = arith.subf %52, %46 : vector<8x128xf32>
    %54 = arith.mulf %53, %51 : vector<8x128xf32>
    %c512_18 = arith.constant 512 : index
    %c0_19 = arith.constant 0 : index
    %55 = vector.load %arg1[%c512_18, %c0_19] : memref<1536x128xbf16, #tpu.memory_space<vmem>>, vector<128x128xbf16>
    %56 = arith.truncf %54 : vector<8x128xf32> to vector<8x128xbf16>
    %cst_20 = arith.constant dense<0.000000e+00> : vector<8x128xf32>
    %57 = tpu.matmul %56, %55, %cst_20 {dimension_numbers = #tpu.dot_dimension_numbers<[1], [0], [0], [1], [0, 0, 1, 1], [], []>} : vector<8x128xbf16>, vector<128x128xbf16>, vector<8x128xf32> -> vector<8x128xf32>
    %58 = vector.extract_strided_slice %0 {offsets = [3, 0], sizes = [1, 128], strides = [1, 1]} : vector<24x384xf32> to vector<1x128xf32>
    %59 = vector.broadcast %58 : vector<1x128xf32> to vector<8x128xf32>
    %60 = arith.addf %57, %59 : vector<8x128xf32>
    %cst_21 = arith.constant 0.000000e+00 : f32
    %61 = vector.broadcast %cst_21 : f32 to vector<8x128xf32>
    %62 = arith.maximumf %60, %61 : vector<8x128xf32>
    %c640_22 = arith.constant 640 : index
    %c0_23 = arith.constant 0 : index
    %63 = vector.load %arg1[%c640_22, %c0_23] : memref<1536x128xbf16, #tpu.memory_space<vmem>>, vector<128x128xbf16>
    %64 = arith.truncf %62 : vector<8x128xf32> to vector<8x128xbf16>
    %cst_24 = arith.constant dense<0.000000e+00> : vector<8x128xf32>
    %65 = tpu.matmul %64, %63, %cst_24 {dimension_numbers = #tpu.dot_dimension_numbers<[1], [0], [0], [1], [0, 0, 1, 1], [], []>} : vector<8x128xbf16>, vector<128x128xbf16>, vector<8x128xf32> -> vector<8x128xf32>
    %66 = vector.extract_strided_slice %0 {offsets = [4, 0], sizes = [1, 128], strides = [1, 1]} : vector<24x384xf32> to vector<1x128xf32>
    %67 = vector.broadcast %66 : vector<1x128xf32> to vector<8x128xf32>
    %68 = arith.addf %65, %67 : vector<8x128xf32>
    %c0_25 = arith.constant 0 : index
    %c0_26 = arith.constant 0 : index
    %69 = vector.load %arg3[%c0_25, %c0_26] : memref<768x160xbf16, #tpu.memory_space<vmem>>, vector<128x160xbf16>
    %70 = arith.truncf %68 : vector<8x128xf32> to vector<8x128xbf16>
    %cst_27 = arith.constant dense<0.000000e+00> : vector<8x160xf32>
    %71 = tpu.matmul %70, %69, %cst_27 {dimension_numbers = #tpu.dot_dimension_numbers<[1], [0], [0], [1], [0, 0, 1, 1], [], []>} : vector<8x128xbf16>, vector<128x160xbf16>, vector<8x160xf32> -> vector<8x160xf32>
    %72 = arith.addf %15, %71 : vector<8x160xf32>
    %cst_28 = arith.constant 0.000000e+00 : f32
    %73 = vector.broadcast %cst_28 : f32 to vector<8x160xf32>
    %74 = arith.maximumf %72, %73 : vector<8x160xf32>
    %c128 = arith.constant 128 : index
    %c0_29 = arith.constant 0 : index
    %75 = vector.load %arg2[%c128, %c0_29] : memref<608x384xbf16, #tpu.memory_space<vmem>>, vector<160x384xbf16>
    %76 = vector.extract_strided_slice %0 {offsets = [6, 0], sizes = [1, 384], strides = [1, 1]} : vector<24x384xf32> to vector<1x384xf32>
    %77 = vector.extract_strided_slice %0 {offsets = [7, 0], sizes = [1, 128], strides = [1, 1]} : vector<24x384xf32> to vector<1x128xf32>
    %78 = arith.truncf %74 : vector<8x160xf32> to vector<8x160xbf16>
    %cst_30 = arith.constant dense<0.000000e+00> : vector<8x384xf32>
    %79 = tpu.matmul %78, %75, %cst_30 {dimension_numbers = #tpu.dot_dimension_numbers<[1], [0], [0], [1], [0, 0, 1, 1], [], []>} : vector<8x160xbf16>, vector<160x384xbf16>, vector<8x384xf32> -> vector<8x384xf32>
    %80 = vector.broadcast %76 : vector<1x384xf32> to vector<8x384xf32>
    %81 = arith.addf %79, %80 : vector<8x384xf32>
    %82 = vector.extract_strided_slice %81 {offsets = [0, 0], sizes = [8, 128], strides = [1, 1]} : vector<8x384xf32> to vector<8x128xf32>
    %83 = arith.negf %82 : vector<8x128xf32>
    %84 = math.exp %83 : vector<8x128xf32>
    %cst_31 = arith.constant 1.000000e+00 : f32
    %85 = vector.broadcast %cst_31 : f32 to vector<8x128xf32>
    %86 = arith.addf %85, %84 : vector<8x128xf32>
    %87 = arith.divf %85, %86 : vector<8x128xf32>
    %88 = vector.extract_strided_slice %81 {offsets = [0, 128], sizes = [8, 128], strides = [1, 1]} : vector<8x384xf32> to vector<8x128xf32>
    %89 = arith.negf %88 : vector<8x128xf32>
    %90 = math.exp %89 : vector<8x128xf32>
    %cst_32 = arith.constant 1.000000e+00 : f32
    %91 = vector.broadcast %cst_32 : f32 to vector<8x128xf32>
    %92 = arith.addf %91, %90 : vector<8x128xf32>
    %93 = arith.divf %91, %92 : vector<8x128xf32>
    %94 = vector.extract_strided_slice %81 {offsets = [0, 256], sizes = [8, 128], strides = [1, 1]} : vector<8x384xf32> to vector<8x128xf32>
    %95 = vector.broadcast %77 : vector<1x128xf32> to vector<8x128xf32>
    %96 = arith.mulf %87, %95 : vector<8x128xf32>
    %97 = arith.addf %94, %96 : vector<8x128xf32>
    %98 = math.tanh %97 : vector<8x128xf32>
    %cst_33 = arith.constant 1.000000e+00 : f32
    %99 = vector.broadcast %cst_33 : f32 to vector<8x128xf32>
    %100 = arith.subf %99, %93 : vector<8x128xf32>
    %101 = arith.mulf %100, %98 : vector<8x128xf32>
    %c768 = arith.constant 768 : index
    %c0_34 = arith.constant 0 : index
    %102 = vector.load %arg1[%c768, %c0_34] : memref<1536x128xbf16, #tpu.memory_space<vmem>>, vector<128x128xbf16>
    %103 = arith.truncf %101 : vector<8x128xf32> to vector<8x128xbf16>
    %cst_35 = arith.constant dense<0.000000e+00> : vector<8x128xf32>
    %104 = tpu.matmul %103, %102, %cst_35 {dimension_numbers = #tpu.dot_dimension_numbers<[1], [0], [0], [1], [0, 0, 1, 1], [], []>} : vector<8x128xbf16>, vector<128x128xbf16>, vector<8x128xf32> -> vector<8x128xf32>
    %105 = vector.extract_strided_slice %0 {offsets = [8, 0], sizes = [1, 128], strides = [1, 1]} : vector<24x384xf32> to vector<1x128xf32>
    %106 = vector.broadcast %105 : vector<1x128xf32> to vector<8x128xf32>
    %107 = arith.addf %104, %106 : vector<8x128xf32>
    %cst_36 = arith.constant 0.000000e+00 : f32
    %108 = vector.broadcast %cst_36 : f32 to vector<8x128xf32>
    %109 = arith.maximumf %107, %108 : vector<8x128xf32>
    %c896 = arith.constant 896 : index
    %c0_37 = arith.constant 0 : index
    %110 = vector.load %arg1[%c896, %c0_37] : memref<1536x128xbf16, #tpu.memory_space<vmem>>, vector<128x128xbf16>
    %111 = arith.truncf %109 : vector<8x128xf32> to vector<8x128xbf16>
    %cst_38 = arith.constant dense<0.000000e+00> : vector<8x128xf32>
    %112 = tpu.matmul %111, %110, %cst_38 {dimension_numbers = #tpu.dot_dimension_numbers<[1], [0], [0], [1], [0, 0, 1, 1], [], []>} : vector<8x128xbf16>, vector<128x128xbf16>, vector<8x128xf32> -> vector<8x128xf32>
    %113 = arith.addf %68, %112 : vector<8x128xf32>
    %c128_39 = arith.constant 128 : index
    %c0_40 = arith.constant 0 : index
    %114 = vector.load %arg3[%c128_39, %c0_40] : memref<768x160xbf16, #tpu.memory_space<vmem>>, vector<128x160xbf16>
    %115 = arith.truncf %113 : vector<8x128xf32> to vector<8x128xbf16>
    %cst_41 = arith.constant dense<0.000000e+00> : vector<8x160xf32>
    %116 = tpu.matmul %115, %114, %cst_41 {dimension_numbers = #tpu.dot_dimension_numbers<[1], [0], [0], [1], [0, 0, 1, 1], [], []>} : vector<8x128xbf16>, vector<128x160xbf16>, vector<8x160xf32> -> vector<8x160xf32>
    %117 = arith.addf %21, %116 : vector<8x160xf32>
    %cst_42 = arith.constant 0.000000e+00 : f32
    %118 = vector.broadcast %cst_42 : f32 to vector<8x160xf32>
    %119 = arith.maximumf %117, %118 : vector<8x160xf32>
    %c288 = arith.constant 288 : index
    %c0_43 = arith.constant 0 : index
    %120 = vector.load %arg2[%c288, %c0_43] : memref<608x384xbf16, #tpu.memory_space<vmem>>, vector<160x384xbf16>
    %121 = vector.extract_strided_slice %0 {offsets = [10, 0], sizes = [1, 384], strides = [1, 1]} : vector<24x384xf32> to vector<1x384xf32>
    %122 = vector.extract_strided_slice %0 {offsets = [11, 0], sizes = [1, 128], strides = [1, 1]} : vector<24x384xf32> to vector<1x128xf32>
    %123 = arith.truncf %119 : vector<8x160xf32> to vector<8x160xbf16>
    %cst_44 = arith.constant dense<0.000000e+00> : vector<8x384xf32>
    %124 = tpu.matmul %123, %120, %cst_44 {dimension_numbers = #tpu.dot_dimension_numbers<[1], [0], [0], [1], [0, 0, 1, 1], [], []>} : vector<8x160xbf16>, vector<160x384xbf16>, vector<8x384xf32> -> vector<8x384xf32>
    %125 = vector.broadcast %121 : vector<1x384xf32> to vector<8x384xf32>
    %126 = arith.addf %124, %125 : vector<8x384xf32>
    %127 = vector.extract_strided_slice %126 {offsets = [0, 0], sizes = [8, 128], strides = [1, 1]} : vector<8x384xf32> to vector<8x128xf32>
    %128 = arith.negf %127 : vector<8x128xf32>
    %129 = math.exp %128 : vector<8x128xf32>
    %cst_45 = arith.constant 1.000000e+00 : f32
    %130 = vector.broadcast %cst_45 : f32 to vector<8x128xf32>
    %131 = arith.addf %130, %129 : vector<8x128xf32>
    %132 = arith.divf %130, %131 : vector<8x128xf32>
    %133 = vector.extract_strided_slice %126 {offsets = [0, 128], sizes = [8, 128], strides = [1, 1]} : vector<8x384xf32> to vector<8x128xf32>
    %134 = arith.negf %133 : vector<8x128xf32>
    %135 = math.exp %134 : vector<8x128xf32>
    %cst_46 = arith.constant 1.000000e+00 : f32
    %136 = vector.broadcast %cst_46 : f32 to vector<8x128xf32>
    %137 = arith.addf %136, %135 : vector<8x128xf32>
    %138 = arith.divf %136, %137 : vector<8x128xf32>
    %139 = vector.extract_strided_slice %126 {offsets = [0, 256], sizes = [8, 128], strides = [1, 1]} : vector<8x384xf32> to vector<8x128xf32>
    %140 = vector.broadcast %122 : vector<1x128xf32> to vector<8x128xf32>
    %141 = arith.mulf %132, %140 : vector<8x128xf32>
    %142 = arith.addf %139, %141 : vector<8x128xf32>
    %143 = math.tanh %142 : vector<8x128xf32>
    %cst_47 = arith.constant 1.000000e+00 : f32
    %144 = vector.broadcast %cst_47 : f32 to vector<8x128xf32>
    %145 = arith.subf %144, %138 : vector<8x128xf32>
    %146 = arith.mulf %145, %143 : vector<8x128xf32>
    %c1024 = arith.constant 1024 : index
    %c0_48 = arith.constant 0 : index
    %147 = vector.load %arg1[%c1024, %c0_48] : memref<1536x128xbf16, #tpu.memory_space<vmem>>, vector<128x128xbf16>
    %148 = arith.truncf %146 : vector<8x128xf32> to vector<8x128xbf16>
    %cst_49 = arith.constant dense<0.000000e+00> : vector<8x128xf32>
    %149 = tpu.matmul %148, %147, %cst_49 {dimension_numbers = #tpu.dot_dimension_numbers<[1], [0], [0], [1], [0, 0, 1, 1], [], []>} : vector<8x128xbf16>, vector<128x128xbf16>, vector<8x128xf32> -> vector<8x128xf32>
    %150 = vector.extract_strided_slice %0 {offsets = [12, 0], sizes = [1, 128], strides = [1, 1]} : vector<24x384xf32> to vector<1x128xf32>
    %151 = vector.broadcast %150 : vector<1x128xf32> to vector<8x128xf32>
    %152 = arith.addf %149, %151 : vector<8x128xf32>
    %cst_50 = arith.constant 0.000000e+00 : f32
    %153 = vector.broadcast %cst_50 : f32 to vector<8x128xf32>
    %154 = arith.maximumf %152, %153 : vector<8x128xf32>
    %c1152 = arith.constant 1152 : index
    %c0_51 = arith.constant 0 : index
    %155 = vector.load %arg1[%c1152, %c0_51] : memref<1536x128xbf16, #tpu.memory_space<vmem>>, vector<128x128xbf16>
    %156 = arith.truncf %154 : vector<8x128xf32> to vector<8x128xbf16>
    %cst_52 = arith.constant dense<0.000000e+00> : vector<8x128xf32>
    %157 = tpu.matmul %156, %155, %cst_52 {dimension_numbers = #tpu.dot_dimension_numbers<[1], [0], [0], [1], [0, 0, 1, 1], [], []>} : vector<8x128xbf16>, vector<128x128xbf16>, vector<8x128xf32> -> vector<8x128xf32>
    %158 = arith.addf %113, %157 : vector<8x128xf32>
    %c256 = arith.constant 256 : index
    %c0_53 = arith.constant 0 : index
    %159 = vector.load %arg3[%c256, %c0_53] : memref<768x160xbf16, #tpu.memory_space<vmem>>, vector<128x160xbf16>
    %160 = arith.truncf %158 : vector<8x128xf32> to vector<8x128xbf16>
    %cst_54 = arith.constant dense<0.000000e+00> : vector<8x160xf32>
    %161 = tpu.matmul %160, %159, %cst_54 {dimension_numbers = #tpu.dot_dimension_numbers<[1], [0], [0], [1], [0, 0, 1, 1], [], []>} : vector<8x128xbf16>, vector<128x160xbf16>, vector<8x160xf32> -> vector<8x160xf32>
    %162 = arith.addf %27, %161 : vector<8x160xf32>
    %cst_55 = arith.constant 0.000000e+00 : f32
    %163 = vector.broadcast %cst_55 : f32 to vector<8x160xf32>
    %164 = arith.maximumf %162, %163 : vector<8x160xf32>
    %c448 = arith.constant 448 : index
    %c0_56 = arith.constant 0 : index
    %165 = vector.load %arg2[%c448, %c0_56] : memref<608x384xbf16, #tpu.memory_space<vmem>>, vector<160x384xbf16>
    %166 = vector.extract_strided_slice %0 {offsets = [14, 0], sizes = [1, 384], strides = [1, 1]} : vector<24x384xf32> to vector<1x384xf32>
    %167 = vector.extract_strided_slice %0 {offsets = [15, 0], sizes = [1, 128], strides = [1, 1]} : vector<24x384xf32> to vector<1x128xf32>
    %168 = arith.truncf %164 : vector<8x160xf32> to vector<8x160xbf16>
    %cst_57 = arith.constant dense<0.000000e+00> : vector<8x384xf32>
    %169 = tpu.matmul %168, %165, %cst_57 {dimension_numbers = #tpu.dot_dimension_numbers<[1], [0], [0], [1], [0, 0, 1, 1], [], []>} : vector<8x160xbf16>, vector<160x384xbf16>, vector<8x384xf32> -> vector<8x384xf32>
    %170 = vector.broadcast %166 : vector<1x384xf32> to vector<8x384xf32>
    %171 = arith.addf %169, %170 : vector<8x384xf32>
    %172 = vector.extract_strided_slice %171 {offsets = [0, 0], sizes = [8, 128], strides = [1, 1]} : vector<8x384xf32> to vector<8x128xf32>
    %173 = arith.negf %172 : vector<8x128xf32>
    %174 = math.exp %173 : vector<8x128xf32>
    %cst_58 = arith.constant 1.000000e+00 : f32
    %175 = vector.broadcast %cst_58 : f32 to vector<8x128xf32>
    %176 = arith.addf %175, %174 : vector<8x128xf32>
    %177 = arith.divf %175, %176 : vector<8x128xf32>
    %178 = vector.extract_strided_slice %171 {offsets = [0, 128], sizes = [8, 128], strides = [1, 1]} : vector<8x384xf32> to vector<8x128xf32>
    %179 = arith.negf %178 : vector<8x128xf32>
    %180 = math.exp %179 : vector<8x128xf32>
    %cst_59 = arith.constant 1.000000e+00 : f32
    %181 = vector.broadcast %cst_59 : f32 to vector<8x128xf32>
    %182 = arith.addf %181, %180 : vector<8x128xf32>
    %183 = arith.divf %181, %182 : vector<8x128xf32>
    %184 = vector.extract_strided_slice %171 {offsets = [0, 256], sizes = [8, 128], strides = [1, 1]} : vector<8x384xf32> to vector<8x128xf32>
    %185 = vector.broadcast %167 : vector<1x128xf32> to vector<8x128xf32>
    %186 = arith.mulf %177, %185 : vector<8x128xf32>
    %187 = arith.addf %184, %186 : vector<8x128xf32>
    %188 = math.tanh %187 : vector<8x128xf32>
    %cst_60 = arith.constant 1.000000e+00 : f32
    %189 = vector.broadcast %cst_60 : f32 to vector<8x128xf32>
    %190 = arith.subf %189, %183 : vector<8x128xf32>
    %191 = arith.mulf %190, %188 : vector<8x128xf32>
    %c1280 = arith.constant 1280 : index
    %c0_61 = arith.constant 0 : index
    %192 = vector.load %arg1[%c1280, %c0_61] : memref<1536x128xbf16, #tpu.memory_space<vmem>>, vector<128x128xbf16>
    %193 = arith.truncf %191 : vector<8x128xf32> to vector<8x128xbf16>
    %cst_62 = arith.constant dense<0.000000e+00> : vector<8x128xf32>
    %194 = tpu.matmul %193, %192, %cst_62 {dimension_numbers = #tpu.dot_dimension_numbers<[1], [0], [0], [1], [0, 0, 1, 1], [], []>} : vector<8x128xbf16>, vector<128x128xbf16>, vector<8x128xf32> -> vector<8x128xf32>
    %195 = vector.extract_strided_slice %0 {offsets = [16, 0], sizes = [1, 128], strides = [1, 1]} : vector<24x384xf32> to vector<1x128xf32>
    %196 = vector.broadcast %195 : vector<1x128xf32> to vector<8x128xf32>
    %197 = arith.addf %194, %196 : vector<8x128xf32>
    %cst_63 = arith.constant 0.000000e+00 : f32
    %198 = vector.broadcast %cst_63 : f32 to vector<8x128xf32>
    %199 = arith.maximumf %197, %198 : vector<8x128xf32>
    %c1408 = arith.constant 1408 : index
    %c0_64 = arith.constant 0 : index
    %200 = vector.load %arg1[%c1408, %c0_64] : memref<1536x128xbf16, #tpu.memory_space<vmem>>, vector<128x128xbf16>
    %201 = arith.truncf %199 : vector<8x128xf32> to vector<8x128xbf16>
    %cst_65 = arith.constant dense<0.000000e+00> : vector<8x128xf32>
    %202 = tpu.matmul %201, %200, %cst_65 {dimension_numbers = #tpu.dot_dimension_numbers<[1], [0], [0], [1], [0, 0, 1, 1], [], []>} : vector<8x128xbf16>, vector<128x128xbf16>, vector<8x128xf32> -> vector<8x128xf32>
    %203 = arith.addf %158, %202 : vector<8x128xf32>
    %c0_66 = arith.constant 0 : index
    %c0_67 = arith.constant 0 : index
    %204 = vector.load %arg5[%c0_66, %c0_67] : memref<8x128xf32, #tpu.memory_space<vmem>>, vector<8x128xf32>
    tpu.vector_store %arg5[%c0_66, %c0_67], %203 {strides = array<i32>} : memref<8x128xf32, #tpu.memory_space<vmem>>, vector<8x128xf32>,
    return
  }
}

</mosaic_0001>

<bundles_post_ra>
// kernel: decoder_forward.1
= control target key start
LH: loop header
LB: loop body
LE: loop exit
PB: predicated region body
PF: predicated region fallthrough
CT: control target
= control target key end

     0   :  { %10 = vsyncpa [#allocation3], 0  ;;  %s4612_s21 = smov [#allocation2]   ;;  %s4613_s23 = smov 64   ;;  %s6030_s0 = inlined_call_operand.vmem [shape: f32[8,512], index: 0, kind: input, shape index: {}]   ;;  %s6031_s1 = inlined_call_operand.hbm [shape: bf16[1536,128], index: 1, kind: input, shape index: {}]   ;;  %s6032_s2 = inlined_call_operand.vmem [shape: bf16[608,384], index: 2, kind: input, shape index: {}]   ;;  %s6033_s3 = inlined_call_operand.vmem [shape: bf16[768,160], index: 3, kind: input, shape index: {}]   ;;  %s6034_s4 = inlined_call_operand.vmem [shape: f32[24,384], index: 4, kind: input, shape index: {}]   ;;  %s6035_s5 = inlined_call_operand.vmem [shape: f32[8,128], index: 5, kind: output, shape index: {}]  }
   0x1   :  { %s17_s20 = sshll.u32 %s6031_s1, 4  ;;  %s19_s22 = sshll.u32 %s4612_s21, 4  ;;  %s18_s20 = int_to_ptr.hbm [resolvable:$true] %s17_s20  ;;  %s20_s22 = int_to_ptr.vmem [resolvable:$true] %s19_s22 }
   0x2   :  { %s4614_s24 = smov 4  }
   0x3   :  { %25 = dma.hbm_to_vmem [thread:$0]  %s18_s20, 12288, %s20_s22, [#allocation3], %s4613_s23, %s4613_s23, %s4614_s24  }
   0x4   :  { %4610 = dma.done.wait [#allocation3], 12288  }
   0x5   :  { %4611 = vsyncadd [#allocation3], 4294955008  ;;  %v4243_v0 = vld [vmem:[#allocation2 + $0x38] sm:$0xff]  ;;  %v4242_v4 = vld [vmem:[#allocation2 + $0x30] sm:$0xff]  ;;  %vm1472_vm8 = vcmask 261120  }
   0x6   :  { %v4251_v1 = vld [vmem:[#allocation2 + $0x78] sm:$0xff]  ;;  %309 = vmatpush.bf16.msra.mxu0 %v4243_v0  ;;  %v4250_v5 = vld [vmem:[#allocation2 + $0x70] sm:$0xff]  ;;  %v4241_v8 = vld [vmem:[#allocation2 + $0x28] sm:$0xff] }
   0x7   :  { %v4259_v2 = vld [vmem:[#allocation2 + $0xb8] sm:$0xff]  ;;  %322 = vmatpush.bf16.msra.mxu1 %v4251_v1  ;;  %v4258_v6 = vld [vmem:[#allocation2 + $0xb0] sm:$0xff]  ;;  %v4249_v9 = vld [vmem:[#allocation2 + $0x68] sm:$0xff] }
   0x8   :  { %v4267_v3 = vld [vmem:[#allocation2 + $0xf8] sm:$0xff]  ;;  %335 = vmatpush.bf16.msra.mxu2 %v4259_v2  ;;  %v4266_v7 = vld [vmem:[#allocation2 + $0xf0] sm:$0xff]  ;;  %v4257_v10 = vld [vmem:[#allocation2 + $0xa8] sm:$0xff] }
   0x9   :  { %348 = vmatpush.bf16.msra.mxu3 %v4267_v3  ;;  %v4265_v11 = vld [vmem:[#allocation2 + $0xe8] sm:$0xff]  ;;  %v4240_v12 = vld [vmem:[#allocation2 + $0x20] sm:$0xff]  ;;  %v4239_v16 = vld [vmem:[#allocation2 + $0x18] sm:$0xff] }
   0xa   :  { %310 = vmatpush.bf16.msra.mxu0 %v4242_v4  ;;  %v4248_v13 = vld [vmem:[#allocation2 + $0x60] sm:$0xff]  ;;  %v4247_v17 = vld [vmem:[#allocation2 + $0x58] sm:$0xff]  ;;  %v4238_v20 = vld [vmem:[#allocation2 + $0x10] sm:$0xff] }
   0xb   :  { %323 = vmatpush.bf16.msra.mxu1 %v4250_v5  ;;  %v4256_v14 = vld [vmem:[#allocation2 + $0xa0] sm:$0xff]  ;;  %v4255_v18 = vld [vmem:[#allocation2 + $0x98] sm:$0xff]  ;;  %v4246_v21 = vld [vmem:[#allocation2 + $0x50] sm:$0xff] }
   0xc   :  { %336 = vmatpush.bf16.msra.mxu2 %v4258_v6  ;;  %v4264_v15 = vld [vmem:[#allocation2 + $0xe0] sm:$0xff]  ;;  %v4263_v19 = vld [vmem:[#allocation2 + $0xd8] sm:$0xff]  ;;  %v4254_v22 = vld [vmem:[#allocation2 + $0x90] sm:$0xff] }
   0xd   :  { %349 = vmatpush.bf16.msra.mxu3 %v4266_v7  ;;  %v4262_v23 = vld [vmem:[#allocation2 + $0xd0] sm:$0xff]  ;;  %v4237_v24 = vld [vmem:[#allocation2 + $0x8] sm:$0xff]  ;;  %v4236_v28 = vld [vmem:[#allocation2] sm:$0xff] }
   0xe   :  { %311 = vmatpush.bf16.msra.mxu0 %v4241_v8  ;;  %v4245_v25 = vld [vmem:[#allocation2 + $0x48] sm:$0xff]  ;;  %v4244_v29 = vld [vmem:[#allocation2 + $0x40] sm:$0xff]  ;;  %v3181_v30 = vld [vmem:[%s6033_s3 + $0x1f0] sm:$0xf] }
   0xf   :  { %324 = vmatpush.bf16.msra.mxu1 %v4249_v9  ;;  %v4253_v26 = vld [vmem:[#allocation2 + $0x88] sm:$0xff]  ;;  %v4252_v31 = vld [vmem:[#allocation2 + $0x80] sm:$0xff]  ;;  %v4283_v33 = vld [vmem:[%s6033_s3 + $0x1f4] sm:$0xf0] }
  0x10   :  { %337 = vmatpush.bf16.msra.mxu2 %v4257_v10  ;;  %v4261_v27 = vld [vmem:[#allocation2 + $0xc8] sm:$0xff]  ;;  %v4260_v32 = vld [vmem:[#allocation2 + $0xc0] sm:$0xff]  ;;  %v4282_v34 = vld [vmem:[%s6033_s3 + $0x1f4] sm:$0xf]  ;;  %v3182_v42 = vor.u32 %v4283_v33, %v3181_v30 }
  0x11   :  { %350 = vmatpush.bf16.msra.mxu3 %v4265_v11  ;;  %v3183_v35 = vld [vmem:[%s6033_s3 + $0x1f8] sm:$0xf0]  ;;  %v44_v36 = vld [vmem:[%s6030_s0] sm:$0xff]  ;;  %v45_v37 = vld [vmem:[%s6030_s0 + $0x8] sm:$0xff] }
  0x12   :  { %312 = vmatpush.bf16.msra.mxu0 %v4240_v12  ;;  %v46_v38 = vld [vmem:[%s6030_s0 + $0x10] sm:$0xff]  ;;  %v47_v39 = vld [vmem:[%s6030_s0 + $0x18] sm:$0xff]  ;;  %v3173_v40 = vld [vmem:[%s6033_s3 + $0x1e0] sm:$0xf]  ;;  %v3186_v43 = vor.u32 %v4282_v34, %v3183_v35  ;;  %v112_v47 = vpack.c.bf16 %v44_v36, %v44_v36  ;;  %v113_v48 = vpack.c.bf16 %v45_v37, %v45_v37 }
  0x13   :  { %325 = vmatpush.bf16.msra.mxu1 %v4248_v13  ;;  %v3245_v41 = vld [vmem:[%s6033_s3 + $0x270] sm:$0xf]  ;;  %v4299_v44 = vld [vmem:[%s6033_s3 + $0x274] sm:$0xf0]  ;;  %v4298_v45 = vld [vmem:[%s6033_s3 + $0x274] sm:$0xf]  ;;  %v114_v52 = vpack.c.bf16 %v46_v38, %v46_v38  ;;  %v115_v53 = vpack.c.bf16 %v47_v39, %v47_v39 }
  0x14   :  { %338 = vmatpush.bf16.msra.mxu2 %v4256_v14  ;;  %v3247_v46 = vld [vmem:[%s6033_s3 + $0x278] sm:$0xf0]  ;;  %v4281_v49 = vld [vmem:[%s6033_s3 + $0x1e4] sm:$0xf0]  ;;  %v4280_v50 = vld [vmem:[%s6033_s3 + $0x1e4] sm:$0xf]  ;;  %v3246_v55 = vor.u32 %v4299_v44, %v3245_v41 }
  0x15   :  { %351 = vmatpush.bf16.msra.mxu3 %v4264_v15  ;;  %v3175_v51 = vld [vmem:[%s6033_s3 + $0x1e8] sm:$0xf0]  ;;  %v3165_v54 = vld [vmem:[%s6033_s3 + $0x1d0] sm:$0xf]  ;;  %v3250_v56 = vor.u32 %v4298_v45, %v3247_v46  ;;  %v3237_v57 = vld [vmem:[%s6033_s3 + $0x260] sm:$0xf]  ;;  %v3174_v58 = vor.u32 %v4281_v49, %v3173_v40 }
  0x16   :  { %313 = vmatpush.bf16.msra.mxu0 %v4239_v16  ;;  %v3178_v59 = vor.u32 %v4280_v50, %v3175_v51  ;;  %v4297_v60 = vld [vmem:[%s6033_s3 + $0x264] sm:$0xf0]  ;;  %v4296_v61 = vld [vmem:[%s6033_s3 + $0x264] sm:$0xf]  ;;  %v3239_v62 = vld [vmem:[%s6033_s3 + $0x268] sm:$0xf0] }
  0x17   :  { %326 = vmatpush.bf16.msra.mxu1 %v4247_v17  ;;  %v4279_v63 = vld [vmem:[%s6033_s3 + $0x1d4] sm:$0xf0]  ;;  %v4278_v0 = vld [vmem:[%s6033_s3 + $0x1d4] sm:$0xf]  ;;  %v3167_v1 = vld [vmem:[%s6033_s3 + $0x1d8] sm:$0xf0]  ;;  %v3238_v3 = vor.u32 %v4297_v60, %v3237_v57  ;;  %v3242_v4 = vor.u32 %v4296_v61, %v3239_v62 }
  0x18   :  { %339 = vmatpush.bf16.msra.mxu2 %v4255_v18  ;;  %v3157_v2 = vld [vmem:[%s6033_s3 + $0x1c0] sm:$0xf]  ;;  %v3229_v5 = vld [vmem:[%s6033_s3 + $0x250] sm:$0xf]  ;;  %v3166_v6 = vor.u32 %v4279_v63, %v3165_v54  ;;  %v3170_v7 = vor.u32 %v4278_v0, %v3167_v1  ;;  %v4295_v8 = vld [vmem:[%s6033_s3 + $0x254] sm:$0xf0] }
  0x19   :  { %352 = vmatpush.bf16.msra.mxu3 %v4263_v19  ;;  %v4294_v9 = vld [vmem:[%s6033_s3 + $0x254] sm:$0xf]  ;;  %v3231_v10 = vld [vmem:[%s6033_s3 + $0x258] sm:$0xf0]  ;;  %v4277_v11 = vld [vmem:[%s6033_s3 + $0x1c4] sm:$0xf0]  ;;  %v3230_v15 = vor.u32 %v4295_v8, %v3229_v5 }
  0x1a   :  { %314 = vmatpush.bf16.msra.mxu0 %v4238_v20  ;;  %v4276_v12 = vld [vmem:[%s6033_s3 + $0x1c4] sm:$0xf]  ;;  %v3159_v13 = vld [vmem:[%s6033_s3 + $0x1c8] sm:$0xf0]  ;;  %v3149_v14 = vld [vmem:[%s6033_s3 + $0x1b0] sm:$0xf]  ;;  %v3234_v16 = vor.u32 %v4294_v9, %v3231_v10  ;;  %v3158_v18 = vor.u32 %v4277_v11, %v3157_v2 }
  0x1b   :  { %327 = vmatpush.bf16.msra.mxu1 %v4246_v21  ;;  %v3221_v17 = vld [vmem:[%s6033_s3 + $0x240] sm:$0xf]  ;;  %v3162_v19 = vor.u32 %v4276_v12, %v3159_v13  ;;  %v4293_v20 = vld [vmem:[%s6033_s3 + $0x244] sm:$0xf0]  ;;  %v4292_v21 = vld [vmem:[%s6033_s3 + $0x244] sm:$0xf] }
  0x1c   :  { %340 = vmatpush.bf16.msra.mxu2 %v4254_v22  ;;  %v3223_v22 = vld [vmem:[%s6033_s3 + $0x248] sm:$0xf0]  ;;  %v4290_v33 = vld [vmem:[%s6033_s3 + $0x234] sm:$0xf]  ;;  %v3215_v34 = vld [vmem:[%s6033_s3 + $0x238] sm:$0xf0] }
  0x1d   :  { %353 = vmatpush.bf16.msra.mxu3 %v4262_v23  ;;  %v4275_v23 = vld [vmem:[%s6033_s3 + $0x1b4] sm:$0xf0]  ;;  %v4273_v35 = vld [vmem:[%s6033_s3 + $0x1a4] sm:$0xf0]  ;;  %v4272_v36 = vld [vmem:[%s6033_s3 + $0x1a4] sm:$0xf]  ;;  %v3218_v40 = vor.u32 %v4290_v33, %v3215_v34 }
  0x1e   :  { %315 = vmatpush.bf16.msra.mxu0 %v4237_v24  ;;  %v4274_v24 = vld [vmem:[%s6033_s3 + $0x1b4] sm:$0xf]  ;;  %v3150_v30 = vor.u32 %v4275_v23, %v3149_v14  ;;  %v3143_v37 = vld [vmem:[%s6033_s3 + $0x1a8] sm:$0xf0]  ;;  %v3133_v38 = vld [vmem:[%s6033_s3 + $0x190] sm:$0xf] }
  0x1f   :  { %328 = vmatpush.bf16.msra.mxu1 %v4245_v25  ;;  %v3151_v25 = vld [vmem:[%s6033_s3 + $0x1b8] sm:$0xf0]  ;;  %v3205_v41 = vld [vmem:[%s6033_s3 + $0x220] sm:$0xf]  ;;  %v4289_v44 = vld [vmem:[%s6033_s3 + $0x224] sm:$0xf0] }
  0x20   :  { %341 = vmatpush.bf16.msra.mxu2 %v4253_v26  ;;  %v3141_v26 = vld [vmem:[%s6033_s3 + $0x1a0] sm:$0xf]  ;;  %v4288_v45 = vld [vmem:[%s6033_s3 + $0x224] sm:$0xf]  ;;  %v3207_v46 = vld [vmem:[%s6033_s3 + $0x228] sm:$0xf0]  ;;  %v3206_v51 = vor.u32 %v4289_v44, %v3205_v41 }
  0x21   :  { %354 = vmatpush.bf16.msra.mxu3 %v4261_v27  ;;  %v3222_v27 = vor.u32 %v4293_v20, %v3221_v17  ;;  %v3135_v49 = vld [vmem:[%s6033_s3 + $0x198] sm:$0xf0]  ;;  %v3125_v50 = vld [vmem:[%s6033_s3 + $0x180] sm:$0xf]  ;;  %v4286_v57 = vld [vmem:[%s6033_s3 + $0x214] sm:$0xf] }
  0x22   :  { %316 = vmatpush.bf16.msra.mxu0 %v4236_v28  ;;  %v3226_v28 = vor.u32 %v4292_v21, %v3223_v22  ;;  %v4268_v60 = vld [vmem:[%s6033_s3 + $0x184] sm:$0xf]  ;;  %v3127_v61 = vld [vmem:[%s6033_s3 + $0x188] sm:$0xf0]  ;;  %v3309_v62 = vld [vmem:[%s6033_s3 + $0x2f0] sm:$0xf] }
  0x23   :  { %329 = vmatpush.bf16.msra.mxu1 %v4244_v29  ;;  %v3213_v29 = vld [vmem:[%s6033_s3 + $0x230] sm:$0xf]  ;;  %v4315_v63 = vld [vmem:[%s6033_s3 + $0x2f4] sm:$0xf0]  ;;  %v3189_v2 = vld [vmem:[%s6033_s3 + $0x200] sm:$0xf] }
  0x24   :  { %342 = vmatpush.bf16.msra.mxu2 %v4252_v31  ;;  %v3154_v31 = vor.u32 %v4274_v24, %v3151_v25  ;;  %v4285_v5 = vld [vmem:[%s6033_s3 + $0x204] sm:$0xf0]  ;;  %v3310_v8 = vor.u32 %v4315_v63, %v3309_v62  ;;  %v3301_v9 = vld [vmem:[%s6033_s3 + $0x2e0] sm:$0xf]  ;;  %v3293_v14 = vld [vmem:[%s6033_s3 + $0x2d0] sm:$0xf] }
  0x25   :  { %355 = vmatpush.bf16.msra.mxu3 %v4260_v32  ;;  %317 = vmatmul.bf16.vlgmr.msra.gmra.mxu0 %v112_v47  ;;  %v4291_v32 = vld [vmem:[%s6033_s3 + $0x234] sm:$0xf0]  ;;  %v4313_v10 = vld [vmem:[%s6033_s3 + $0x2e4] sm:$0xf0]  ;;  %v3190_v11 = vor.u32 %v4285_v5, %v3189_v2  ;;  %v3285_v17 = vld [vmem:[%s6033_s3 + $0x2c0] sm:$0xf] }
  0x26   :  { %461 = vmatpush.bf16.msrb.mxu0 %v3182_v42  ;;  %330 = vmatmul.bf16.vlgmr.msra.gmra.mxu1 %v113_v48  ;;  %v3214_v39 = vor.u32 %v4291_v32, %v3213_v29  ;;  %v3142_v42 = vor.u32 %v4273_v35, %v3141_v26  ;;  %v4271_v47 = vld [vmem:[%s6033_s3 + $0x194] sm:$0xf0]  ;;  %v4270_v48 = vld [vmem:[%s6033_s3 + $0x194] sm:$0xf]  ;;  %v3302_v13 = vor.u32 %v4313_v10, %v3301_v9  ;;  %v3311_v21 = vld [vmem:[%s6033_s3 + $0x2f8] sm:$0xf0] }
  0x27   :  { %474 = vmatpush.bf16.msrb.mxu1 %v3186_v43  ;;  %343 = vmatmul.bf16.vlgmr.msra.gmra.mxu2 %v114_v52  ;;  %v3146_v43 = vor.u32 %v4272_v36, %v3143_v37  ;;  %v3210_v52 = vor.u32 %v4288_v45, %v3207_v46  ;;  %v3134_v54 = vor.u32 %v4271_v47, %v3133_v38  ;;  %v4314_v20 = vld [vmem:[%s6033_s3 + $0x2f4] sm:$0xf]  ;;  %v3401_v22 = vld [vmem:[%s6032_s2 + $0xa8] sm:$0xf]  ;;  %v4337_v25 = vld [vmem:[%s6032_s2 + $0xac] sm:$0xf] }
  0x28   :  { %356 = vmatmul.bf16.vlgmr.msra.gmra.mxu3 %v115_v53  ;;  %585 = vmatpush.bf16.msrb.mxu2 %v3246_v55  ;;  %v3197_v53 = vld [vmem:[%s6033_s3 + $0x210] sm:$0xf]  ;;  %v3138_v55 = vor.u32 %v4270_v48, %v3135_v49  ;;  %v3314_v23 = vor.u32 %v4314_v20, %v3311_v21  ;;  %v4338_v24 = vld [vmem:[%s6032_s2 + $0xb0] sm:$0xf0]  ;;  %v3403_v26 = vld [vmem:[%s6032_s2 + $0xb4] sm:$0xf0] }
  0x29   :  { %598 = vmatpush.bf16.msrb.mxu3 %v3250_v56  ;;  %v4287_v56 = vld [vmem:[%s6033_s3 + $0x214] sm:$0xf0]  ;;  %v3277_v29 = vld [vmem:[%s6033_s3 + $0x2b0] sm:$0xf]  ;;  %v4312_v32 = vld [vmem:[%s6033_s3 + $0x2e4] sm:$0xf] }
  0x2a   :  { %462 = vmatpush.bf16.msrb.mxu0 %v3174_v58  ;;  %v3199_v58 = vld [vmem:[%s6033_s3 + $0x218] sm:$0xf0]  ;;  %v3198_v0 = vor.u32 %v4287_v56, %v3197_v53  ;;  %v3303_v33 = vld [vmem:[%s6033_s3 + $0x2e8] sm:$0xf0]  ;;  %v3389_v34 = vld [vmem:[%s6032_s2 + $0x90] sm:$0xf] }
  0x2b   :  { %475 = vmatpush.bf16.msrb.mxu1 %v3178_v59  ;;  %v4269_v59 = vld [vmem:[%s6033_s3 + $0x184] sm:$0xf0]  ;;  %v3202_v1 = vor.u32 %v4286_v57, %v3199_v58  ;;  %v3306_v35 = vor.u32 %v4312_v32, %v3303_v33  ;;  %v4335_v36 = vld [vmem:[%s6032_s2 + $0x98] sm:$0xf0]  ;;  %v4334_v37 = vld [vmem:[%s6032_s2 + $0x94] sm:$0xf] }
  0x2c   :  { %586 = vmatpush.bf16.msrb.mxu2 %v3238_v3  ;;  %v3126_v3 = vor.u32 %v4269_v59, %v3125_v50  ;;  %v3391_v38 = vld [vmem:[%s6032_s2 + $0x9c] sm:$0xf0]  ;;  %v4310_v44 = vld [vmem:[%s6033_s3 + $0x2d4] sm:$0xf]  ;;  %v3295_v45 = vld [vmem:[%s6033_s3 + $0x2d8] sm:$0xf0] }
  0x2d   :  { %599 = vmatpush.bf16.msrb.mxu3 %v3242_v4  ;;  %v3130_v4 = vor.u32 %v4268_v60, %v3127_v61  ;;  %v3269_v41 = vld [vmem:[%s6033_s3 + $0x2a0] sm:$0xf]  ;;  %v3377_v46 = vld [vmem:[%s6032_s2 + $0x78] sm:$0xf]  ;;  %v3298_v47 = vor.u32 %v4310_v44, %v3295_v45  ;;  %v4332_v48 = vld [vmem:[%s6032_s2 + $0x80] sm:$0xf0] }
  0x2e   :  { %463 = vmatpush.bf16.msrb.mxu0 %v3166_v6  ;;  %v4284_v6 = vld [vmem:[%s6033_s3 + $0x204] sm:$0xf]  ;;  %v4331_v49 = vld [vmem:[%s6032_s2 + $0x7c] sm:$0xf]  ;;  %v3379_v50 = vld [vmem:[%s6032_s2 + $0x84] sm:$0xf0] }
  0x2f   :  { %476 = vmatpush.bf16.msrb.mxu1 %v3170_v7  ;;  %v3191_v7 = vld [vmem:[%s6033_s3 + $0x208] sm:$0xf0]  ;;  %v3261_v53 = vld [vmem:[%s6033_s3 + $0x290] sm:$0xf]  ;;  %v4308_v56 = vld [vmem:[%s6033_s3 + $0x2c4] sm:$0xf] }
  0x30   :  { %587 = vmatpush.bf16.msrb.mxu2 %v3230_v15  ;;  %v3194_v12 = vor.u32 %v4284_v6, %v3191_v7  ;;  %v4311_v15 = vld [vmem:[%s6033_s3 + $0x2d4] sm:$0xf0]  ;;  %v3287_v57 = vld [vmem:[%s6033_s3 + $0x2c8] sm:$0xf0]  ;;  %v3365_v58 = vld [vmem:[%s6032_s2 + $0x60] sm:$0xf] }
  0x31   :  { %600 = vmatpush.bf16.msrb.mxu3 %v3234_v16  ;;  %v3294_v16 = vor.u32 %v4311_v15, %v3293_v14  ;;  %v3290_v59 = vor.u32 %v4308_v56, %v3287_v57  ;;  %v4329_v60 = vld [vmem:[%s6032_s2 + $0x68] sm:$0xf0]  ;;  %v4328_v61 = vld [vmem:[%s6032_s2 + $0x64] sm:$0xf]  ;;  %v3367_v62 = vld [vmem:[%s6032_s2 + $0x6c] sm:$0xf0] }
  0x32   :  { %464 = vmatpush.bf16.msrb.mxu0 %v3158_v18  ;;  %v4309_v18 = vld [vmem:[%s6033_s3 + $0x2c4] sm:$0xf0]  ;;  %v3366_v63 = vor.u32 %v4329_v60, %v3365_v58  ;;  %v3279_v5 = vld [vmem:[%s6033_s3 + $0x2b8] sm:$0xf0]  ;;  %v4325_v9 = vld [vmem:[%s6032_s2 + $0x4c] sm:$0xf] }
  0x33   :  { %477 = vmatpush.bf16.msrb.mxu1 %v3162_v19  ;;  %v3286_v19 = vor.u32 %v4309_v18, %v3285_v17  ;;  %v4301_v2 = vld [vmem:[%s6033_s3 + $0x284] sm:$0xf0]  ;;  %v3355_v10 = vld [vmem:[%s6032_s2 + $0x54] sm:$0xf0]  ;;  %v3271_v14 = vld [vmem:[%s6033_s3 + $0x2a8] sm:$0xf0] }
  0x34   :  { %588 = vmatpush.bf16.msrb.mxu2 %v3222_v27  ;;  %v3402_v27 = vor.u32 %v4338_v24, %v3401_v22  ;;  %v3353_v6 = vld [vmem:[%s6032_s2 + $0x48] sm:$0xf]  ;;  %v3341_v15 = vld [vmem:[%s6032_s2 + $0x30] sm:$0xf]  ;;  %v4323_v17 = vld [vmem:[%s6032_s2 + $0x38] sm:$0xf0] }
  0x35   :  { %601 = vmatpush.bf16.msrb.mxu3 %v3226_v28  ;;  %v3406_v28 = vor.u32 %v4337_v25, %v3403_v26  ;;  %v4322_v18 = vld [vmem:[%s6032_s2 + $0x34] sm:$0xf]  ;;  %v3342_v20 = vor.u32 %v4323_v17, %v3341_v15  ;;  %v3329_v24 = vld [vmem:[%s6032_s2 + $0x18] sm:$0xf]  ;;  %v4320_v26 = vld [vmem:[%s6032_s2 + $0x20] sm:$0xf0] }
  0x36   :  { %465 = vmatpush.bf16.msrb.mxu0 %v3150_v30  ;;  %v4307_v30 = vld [vmem:[%s6033_s3 + $0x2b4] sm:$0xf0]  ;;  %v4302_v22 = vld [vmem:[%s6033_s3 + $0x294] sm:$0xf]  ;;  %v4300_v32 = vld [vmem:[%s6033_s3 + $0x284] sm:$0xf] }
  0x37   :  { %478 = vmatpush.bf16.msrb.mxu1 %v3154_v31  ;;  %v3278_v31 = vor.u32 %v4307_v30, %v3277_v29  ;;  %v3330_v29 = vor.u32 %v4320_v26, %v3329_v24  ;;  %v3255_v33 = vld [vmem:[%s6033_s3 + $0x288] sm:$0xf0]  ;;  %v4336_v60 = vld [vmem:[%s6032_s2 + $0xa0] sm:$0xf0] }
  0x38   :  { %589 = vmatpush.bf16.msrb.mxu2 %v3214_v39  ;;  %v3390_v39 = vor.u32 %v4335_v36, %v3389_v34  ;;  %v3317_v34 = vld [vmem:[%s6032_s2] sm:$0xf]  ;;  %v4317_v36 = vld [vmem:[%s6032_s2 + $0x8] sm:$0xf0] }
  0x39   :  { %602 = vmatpush.bf16.msrb.mxu3 %v3218_v40  ;;  %v3394_v40 = vor.u32 %v4334_v37, %v3391_v38  ;;  %v4316_v37 = vld [vmem:[%s6032_s2 + $0x4] sm:$0xf]  ;;  %v3319_v38 = vld [vmem:[%s6032_s2 + $0xc] sm:$0xf0]  ;;  %v4345_v24 = vld [vmem:[#allocation2 + $0x128] sm:$0xff] }
  0x3a   :  { %466 = vmatpush.bf16.msrb.mxu0 %v3142_v42  ;;  %v4305_v42 = vld [vmem:[%s6033_s3 + $0x2a4] sm:$0xf0] }
  0x3b   :  { %479 = vmatpush.bf16.msrb.mxu1 %v3146_v43  ;;  %v3270_v43 = vor.u32 %v4305_v42, %v3269_v41 }
  0x3c   :  { %590 = vmatpush.bf16.msrb.mxu2 %v3206_v51  ;;  %v3378_v51 = vor.u32 %v4332_v48, %v3377_v46 }
  0x3d   :  { %603 = vmatpush.bf16.msrb.mxu3 %v3210_v52  ;;  %v3382_v52 = vor.u32 %v4331_v49, %v3379_v50 }
  0x3e   :  { %467 = vmatpush.bf16.msrb.mxu0 %v3134_v54  ;;  %v4303_v54 = vld [vmem:[%s6033_s3 + $0x294] sm:$0xf0] }
  0x3f   :  { %480 = vmatpush.bf16.msrb.mxu1 %v3138_v55  ;;  %v3262_v55 = vor.u32 %v4303_v54, %v3261_v53  ;;  %v4339_v53 = vld [vmem:[%s6032_s2 + $0xb8] sm:$0xf0] }
  0x40   :  { %591 = vmatpush.bf16.msrb.mxu2 %v3198_v0  ;;  %v3370_v0 = vor.u32 %v4328_v61, %v3367_v62  ;;  %v3385_v62 = vld [vmem:[%s6032_s2 + $0x80] sm:$0xf] }
  0x41   :  { %604 = vmatpush.bf16.msrb.mxu3 %v3202_v1  ;;  %v3253_v1 = vld [vmem:[%s6033_s3 + $0x280] sm:$0xf] }
  0x42   :  { %468 = vmatpush.bf16.msrb.mxu0 %v3126_v3  ;;  %v3254_v3 = vor.u32 %v4301_v2, %v3253_v1  ;;  %v3373_v1 = vld [vmem:[%s6032_s2 + $0x68] sm:$0xf]  ;;  %v4330_v2 = vld [vmem:[%s6032_s2 + $0x70] sm:$0xf0] }
  0x43   :  { %481 = vmatpush.bf16.msrb.mxu1 %v3130_v4  ;;  %v4306_v4 = vld [vmem:[%s6033_s3 + $0x2b4] sm:$0xf] }
  0x44   :  { %592 = vmatpush.bf16.msrb.mxu2 %v3190_v11  ;;  %v3282_v7 = vor.u32 %v4306_v4, %v3279_v5  ;;  %v3361_v4 = vld [vmem:[%s6032_s2 + $0x50] sm:$0xf]  ;;  %v4327_v5 = vld [vmem:[%s6032_s2 + $0x58] sm:$0xf0] }
  0x45   :  { %605 = vmatpush.bf16.msrb.mxu3 %v3194_v12  ;;  %v3358_v12 = vor.u32 %v4325_v9, %v3355_v10  ;;  %v3337_v10 = vld [vmem:[%s6032_s2 + $0x20] sm:$0xf] }
  0x46   :  { %709 = vmatpush.bf16.msra.mxu0 %v3310_v8  ;;  %v4326_v8 = vld [vmem:[%s6032_s2 + $0x50] sm:$0xf0] }
  0x47   :  { %722 = vmatpush.bf16.msra.mxu1 %v3314_v23  ;;  %v3354_v11 = vor.u32 %v4326_v8, %v3353_v6  ;;  %v3263_v23 = vld [vmem:[%s6033_s3 + $0x298] sm:$0xf0]  ;;  %v3362_v6 = vor.u32 %v4327_v5, %v3361_v4  ;;  %v4324_v8 = vld [vmem:[%s6032_s2 + $0x40] sm:$0xf0] }
  0x48   :  { %898 = vmatpush.bf16.msra.mxu2 %v3402_v27  ;;  %v3266_v25 = vor.u32 %v4302_v22, %v3263_v23  ;;  %v4319_v27 = vld [vmem:[%s6032_s2 + $0x1c] sm:$0xf]  ;;  %v4346_v23 = vld [vmem:[#allocation2 + $0x130] sm:$0xff] }
  0x49   :  { %911 = vmatpush.bf16.msra.mxu3 %v3406_v28  ;;  %v3331_v28 = vld [vmem:[%s6032_s2 + $0x24] sm:$0xf0] }
  0x4a   :  { %710 = vmatpush.bf16.msra.mxu0 %v3302_v13  ;;  %v4304_v13 = vld [vmem:[%s6033_s3 + $0x2a4] sm:$0xf]  ;;  %v3334_v30 = vor.u32 %v4319_v27, %v3331_v28 }
  0x4b   :  { %723 = vmatpush.bf16.msra.mxu1 %v3306_v35  ;;  %v3258_v35 = vor.u32 %v4300_v32, %v3255_v33 }
  0x4c   :  { %899 = vmatpush.bf16.msra.mxu2 %v3390_v39  ;;  %v3318_v39 = vor.u32 %v4317_v36, %v3317_v34  ;;  %v4343_v34 = vld [vmem:[#allocation2 + $0x118] sm:$0xff] }
  0x4d   :  { %912 = vmatpush.bf16.msra.mxu3 %v3394_v40  ;;  %v3322_v40 = vor.u32 %v4316_v37, %v3319_v38 }
  0x4e   :  { %711 = vmatpush.bf16.msra.mxu0 %v3294_v16  ;;  %v3274_v16 = vor.u32 %v4304_v13, %v3271_v14  ;;  %v3325_v13 = vld [vmem:[%s6032_s2 + $0x8] sm:$0xf]  ;;  %v4318_v14 = vld [vmem:[%s6032_s2 + $0x10] sm:$0xf0] }
  0x4f   :  { %724 = vmatpush.bf16.msra.mxu1 %v3298_v47  ;;  %v3326_v15 = vor.u32 %v4318_v14, %v3325_v13 }
  0x50   :  { %900 = vmatpush.bf16.msra.mxu2 %v3378_v51 }
  0x51   :  { %913 = vmatpush.bf16.msra.mxu3 %v3382_v52  ;;  %v3409_v52 = vld [vmem:[%s6032_s2 + $0xb0] sm:$0xf] }
  0x52   :  { %712 = vmatpush.bf16.msra.mxu0 %v3286_v19  ;;  %v3343_v19 = vld [vmem:[%s6032_s2 + $0x3c] sm:$0xf0]  ;;  %v3410_v56 = vor.u32 %v4339_v53, %v3409_v52  ;;  %v4355_v53 = vld [vmem:[#allocation2 + $0x178] sm:$0xff] }
  0x53   :  { %725 = vmatpush.bf16.msra.mxu1 %v3290_v59  ;;  %v3346_v21 = vor.u32 %v4322_v18, %v3343_v19  ;;  %v3397_v59 = vld [vmem:[%s6032_s2 + $0x98] sm:$0xf] }
  0x54   :  { %901 = vmatpush.bf16.msra.mxu2 %v3366_v63  ;;  %v3398_v61 = vor.u32 %v4336_v60, %v3397_v59  ;;  %v4333_v63 = vld [vmem:[%s6032_s2 + $0x88] sm:$0xf0]  ;;  %v4347_v18 = vld [vmem:[#allocation2 + $0x138] sm:$0xff] }
  0x55   :  { %914 = vmatpush.bf16.msra.mxu3 %v3370_v0  ;;  %v3386_v0 = vor.u32 %v4333_v63, %v3385_v62  ;;  %v5120_v63 = vld [vmem:[%s6034_s4 + $0x10] sm:$0xff] }
  0x56   :  { %713 = vmatpush.bf16.msra.mxu0 %v3278_v31  ;;  %v5029_v31 = vld [vmem:[%s6034_s4] sm:$0xff]  ;;  %v769_v5 = vperm.slane %v5120_v63, 1 }
  0x57   :  { %726 = vmatpush.bf16.msra.mxu1 %v3282_v7  ;;  %v116_v41 = vperm.slane %v5029_v31, 0  ;;  %v3349_v7 = vld [vmem:[%s6032_s2 + $0x38] sm:$0xf]  ;;  %v767_v32 = vperm.slane %v5029_v31, 1 }
  0x58   :  { %902 = vmatpush.bf16.msra.mxu2 %v3354_v11  ;;  %v3350_v9 = vor.u32 %v4324_v8, %v3349_v7  ;;  %v4321_v11 = vld [vmem:[%s6032_s2 + $0x28] sm:$0xf0]  ;;  %v975_v7 = vperm.slane %v5029_v31, 2 }
  0x59   :  { %915 = vmatpush.bf16.msra.mxu3 %v3358_v12  ;;  %v3338_v12 = vor.u32 %v4321_v11, %v3337_v10 }
  0x5a   :  { %714 = vmatpush.bf16.msra.mxu0 %v3270_v43 }
  0x5b   :  { %727 = vmatpush.bf16.msra.mxu1 %v3274_v16 }
  0x5c   :  { %903 = vmatpush.bf16.msra.mxu2 %v3342_v20 }
  0x5d   :  { %916 = vmatpush.bf16.msra.mxu3 %v3346_v21 }
  0x5e   :  { %715 = vmatpush.bf16.msra.mxu0 %v3262_v55 }
  0x5f   :  { %728 = vmatpush.bf16.msra.mxu1 %v3266_v25 }
  0x60   :  { %904 = vmatpush.bf16.msra.mxu2 %v3330_v29  ;;  %v4344_v29 = vld [vmem:[#allocation2 + $0x120] sm:$0xff] }
  0x61   :  { %917 = vmatpush.bf16.msra.mxu3 %v3334_v30  ;;  %v5113_v30 = vld [vmem:[%s6034_s4 + $0x8] sm:$0xff] }
  0x62   :  { %716 = vmatpush.bf16.msra.mxu0 %v3254_v3  ;;  %v3374_v3 = vor.u32 %v4330_v2, %v3373_v1  ;;  %v768_v33 = vperm.slane %v5113_v30, 1  ;;  %v4352_v1 = vld [vmem:[#allocation2 + $0x160] sm:$0xff] }
  0x63   :  { %729 = vmatpush.bf16.msra.mxu1 %v3258_v35 }
  0x64   :  { %905 = vmatpush.bf16.msra.mxu2 %v3318_v39 }
  0x65   :  { %918 = vmatpush.bf16.msra.mxu3 %v3322_v40 }
  0xa2   :  { %v318_v42 = vpop.f32.mrf.mxu0 }
  0xa3   :  { %v331_v43 = vpop.f32.mrf.mxu1  ;;  %v319_v44 = vadd.f32 %v318_v42, %v116_v41  ;;  %v4342_v41 = vld [vmem:[#allocation2 + $0x110] sm:$0xff] }
  0xa5   :  { %v332_v45 = vadd.f32 %v331_v43, %v319_v44  ;;  %v4341_v44 = vld [vmem:[#allocation2 + $0x108] sm:$0xff] }
  0xaa   :  { %v344_v46 = vpop.f32.mrf.mxu2  ;;  %v320_v49 = vpop.f32.mrf.mxu0 }
  0xab   :  { %v357_v47 = vpop.f32.mrf.mxu3  ;;  %v345_v48 = vadd.f32 %v344_v46, %v332_v45  ;;  %v333_v50 = vpop.f32.mrf.mxu1 }
  0xad   :  { %v358_v51 = vadd.f32 %v357_v47, %v345_v48  ;;  %v4340_v47 = vld [vmem:[#allocation2 + $0x100] sm:$0xff] }
  0xaf   :  { %v361_v54 = vmax.f32 %v358_v51, 0.0 }
  0xb1   :  { %v378_v55 = vpack.c.bf16 %v361_v54, %v361_v54  ;;  %v4354_v54 = vld [vmem:[#allocation2 + $0x170] sm:$0xff] }
  0xb2   :  { %v346_v57 = vpop.f32.mrf.mxu2 }
  0xb3   :  { %v359_v58 = vpop.f32.mrf.mxu3  ;;  %469 = vmatmul.bf16.vlgmr.msrb.gmra.mxu0 %v378_v55  ;;  %482 = vmatmul.bf16.vlgmr.msrb.gmra.mxu1 %v378_v55  ;;  %v4353_v57 = vld [vmem:[#allocation2 + $0x168] sm:$0xff] }
  0xb4   :  { %593 = vmatmul.bf16.vlgmr.msrb.gmra.mxu2 %v378_v55  ;;  %606 = vmatmul.bf16.vlgmr.msrb.gmra.mxu3 %v378_v55 }
  0xb5   :  { %924 = vmatpush.bf16.msrb.mxu0 %v3410_v56  ;;  %1047 = vmatpush.bf16.msrb.mxu1 %v4347_v18 }
  0xb6   :  { %1127 = vmatpush.bf16.msrb.mxu2 %v4355_v53 }
  0xb9   :  { %925 = vmatpush.bf16.msrb.mxu0 %v3398_v61  ;;  %1048 = vmatpush.bf16.msrb.mxu1 %v4346_v23 }
  0xba   :  { %1128 = vmatpush.bf16.msrb.mxu2 %v4354_v54  ;;  %v3511_v54 = vld [vmem:[%s6033_s3 + $0x40] sm:$0xf] }
  0xbd   :  { %926 = vmatpush.bf16.msrb.mxu0 %v3386_v0  ;;  %1049 = vmatpush.bf16.msrb.mxu1 %v4345_v24 }
  0xbe   :  { %1129 = vmatpush.bf16.msrb.mxu2 %v4353_v57  ;;  %v3513_v57 = vld [vmem:[%s6033_s3 + $0x48] sm:$0xf0] }
  0xc1   :  { %927 = vmatpush.bf16.msrb.mxu0 %v3374_v3  ;;  %1050 = vmatpush.bf16.msrb.mxu1 %v4344_v29 }
  0xc2   :  { %1130 = vmatpush.bf16.msrb.mxu2 %v4352_v1 }
  0xc3   :  { %717 = vmatmul.bf16.vlgmr.msra.gmra.mxu0 %v378_v55  ;;  %730 = vmatmul.bf16.vlgmr.msra.gmra.mxu1 %v378_v55 }
  0xc4   :  { %906 = vmatmul.bf16.vlgmr.msra.gmra.mxu2 %v378_v55  ;;  %919 = vmatmul.bf16.vlgmr.msra.gmra.mxu3 %v378_v55 }
  0xc5   :  { %928 = vmatpush.bf16.msrb.mxu0 %v3362_v6  ;;  %1051 = vmatpush.bf16.msrb.mxu1 %v4343_v34  ;;  %v4349_v34 = vld [vmem:[#allocation2 + $0x148] sm:$0xff] }
  0xc9   :  { %929 = vmatpush.bf16.msrb.mxu0 %v3350_v9  ;;  %1052 = vmatpush.bf16.msrb.mxu1 %v4342_v41  ;;  %v4351_v9 = vld [vmem:[#allocation2 + $0x158] sm:$0xff]  ;;  %v3527_v41 = vld [vmem:[%s6033_s3 + $0x60] sm:$0xf] }
  0xca   :  { %1131 = vmatpush.bf16.msrb.mxu2 %v4351_v9  ;;  %v3487_v9 = vld [vmem:[%s6033_s3 + $0x10] sm:$0xf] }
  0xcd   :  { %930 = vmatpush.bf16.msrb.mxu0 %v3338_v12  ;;  %1053 = vmatpush.bf16.msrb.mxu1 %v4341_v44  ;;  %v4368_v44 = vld [vmem:[%s6033_s3 + $0x64] sm:$0xf] }
  0xd1   :  { %931 = vmatpush.bf16.msrb.mxu0 %v3326_v15  ;;  %1054 = vmatpush.bf16.msrb.mxu1 %v4340_v47 }
  0xd4   :  { %932 = vmatmul.bf16.vlgmr.msrb.gmra.mxu0 %v378_v55 }
 0x130   :  { %v5098_v16 = vpop.f32.mrf.mxu0  ;;  %v5100_v17 = vpop.f32.mrf.mxu1 }
 0x137   :  { %v5102_v19 = vpop.f32.mrf.mxu2  ;;  %v5104_v20 = vpop.f32.mrf.mxu3 }
 0x138   :  { %v472_v21 = vpop.f32.mrf.mxu0  ;;  %v485_v22 = vpop.f32.mrf.mxu1 }
 0x139   :  { %v4350_v21 = vld [vmem:[#allocation2 + $0x150] sm:$0xff] }
 0x13a   :  { %1132 = vmatpush.bf16.msrb.mxu2 %v4350_v21 }
 0x13e   :  { %1133 = vmatpush.bf16.msrb.mxu2 %v4349_v34 }
 0x13f   :  { %v596_v25 = vpop.f32.mrf.mxu2  ;;  %v609_v26 = vpop.f32.mrf.mxu3 }
 0x140   :  { %v5106_v27 = vpop.f32.mrf.mxu0  ;;  %v5108_v28 = vpop.f32.mrf.mxu1 }
 0x147   :  { %v907_v35 = vpop.f32.mrf.mxu2  ;;  %v920_v36 = vpop.f32.mrf.mxu3 }
 0x148   :  { %v908_v37 = vadd.f32 %v907_v35, %v767_v32  ;;  %v921_v38 = vadd.f32 %v920_v36, %v768_v33  ;;  %v720_v39 = vpop.f32.mrf.mxu0  ;;  %v733_v40 = vpop.f32.mrf.mxu1  ;;  %v4348_v35 = vld [vmem:[#allocation2 + $0x140] sm:$0xff]  ;;  %v3535_v36 = vld [vmem:[%s6033_s3 + $0x70] sm:$0xf] }
 0x149   :  { %1134 = vmatpush.bf16.msrb.mxu2 %v4348_v35  ;;  %v3537_v40 = vld [vmem:[%s6033_s3 + $0x78] sm:$0xf0]  ;;  %v3627_v35 = vld [vmem:[%s6032_s2 + $0x168] sm:$0xf] }
 0x14a   :  { %v3411_v42 = vmul.f32 -1.442695, %v908_v37  ;;  %v3412_v43 = vmul.f32 -1.442695, %v921_v38  ;;  %v4371_v37 = vld [vmem:[%s6033_s3 + $0x74] sm:$0xf0] }
 0x14b   :  { %v4370_v38 = vld [vmem:[%s6033_s3 + $0x74] sm:$0xf]  ;;  %v3536_v39 = vor.u32 %v4371_v37, %v3535_v36  ;;  %v4393_v37 = vld [vmem:[%s6032_s2 + $0x16c] sm:$0xf] }
 0x14c   :  { %4545 = vpow2.f32 %v3411_v42  ;;  %v4369_v42 = vld [vmem:[%s6033_s3 + $0x64] sm:$0xf0]  ;;  %v4394_v36 = vld [vmem:[%s6032_s2 + $0x170] sm:$0xf0] }
 0x14d   :  { %4547 = vpow2.f32 %v3412_v43  ;;  %v3540_v43 = vor.u32 %v4370_v38, %v3537_v40  ;;  %1237 = vmatpush.bf16.msrb.mxu3 %v3536_v39  ;;  %v3628_v38 = vor.u32 %v4394_v36, %v3627_v35  ;;  %v3629_v39 = vld [vmem:[%s6032_s2 + $0x174] sm:$0xf0]  ;;  %v3635_v40 = vld [vmem:[%s6032_s2 + $0x170] sm:$0xf] }
 0x14e   :  { %v3567_v36 = vld [vmem:[%s6032_s2 + $0xf0] sm:$0xf] }
 0x14f   :  { %v909_v45 = vpop.f32.mrf.mxu2  ;;  %v922_v46 = vpop.f32.mrf.mxu3  ;;  %1250 = vmatpush.bf16.msra.mxu0 %v3540_v43  ;;  %1476 = vmatpush.bf16.msra.mxu1 %v3628_v38  ;;  %v4378_v38 = vld [vmem:[%s6032_s2 + $0xf4] sm:$0xf] }
 0x150   :  { %v3529_v45 = vld [vmem:[%s6033_s3 + $0x68] sm:$0xf0]  ;;  %v3528_v46 = vor.u32 %v4369_v42, %v3527_v41  ;;  %v4395_v41 = vld [vmem:[%s6032_s2 + $0x178] sm:$0xf0]  ;;  %v3632_v42 = vor.u32 %v4393_v37, %v3629_v39 }
 0x151   :  { %v933_v48 = vpop.f32.mrf.mxu0  ;;  %v3532_v47 = vor.u32 %v4368_v44, %v3529_v45  ;;  %v3636_v43 = vor.u32 %v4395_v41, %v3635_v40  ;;  %v3615_v44 = vld [vmem:[%s6032_s2 + $0x150] sm:$0xf]  ;;  %v4391_v45 = vld [vmem:[%s6032_s2 + $0x158] sm:$0xf0]  ;;  %v3569_v40 = vld [vmem:[%s6032_s2 + $0xfc] sm:$0xf0] }
 0x152   :  { %v4546_v49 = vpop.eup %4545  ;;  %v934_v13 = vadd.f32 %v933_v48, %v769_v5  ;;  %v3519_v48 = vld [vmem:[%s6033_s3 + $0x50] sm:$0xf]  ;;  %1238 = vmatpush.bf16.msrb.mxu3 %v3528_v46  ;;  %v4360_v5 = vld [vmem:[%s6033_s3 + $0x24] sm:$0xf]  ;;  %v4390_v46 = vld [vmem:[%s6032_s2 + $0x154] sm:$0xf] }
 0x153   :  { %v4548_v50 = vpop.eup %4547  ;;  %v940_v51 = vadd.f32 1.0, %v4546_v49  ;;  %v4367_v49 = vld [vmem:[%s6033_s3 + $0x54] sm:$0xf0]  ;;  %1251 = vmatpush.bf16.msra.mxu0 %v3532_v47  ;;  %v3616_v47 = vor.u32 %v4391_v45, %v3615_v44  ;;  %v4379_v37 = vld [vmem:[%s6032_s2 + $0xf8] sm:$0xf0] }
 0x154   :  { %v959_v52 = vadd.f32 1.0, %v4548_v50  ;;  %v4366_v50 = vld [vmem:[%s6033_s3 + $0x54] sm:$0xf]  ;;  %v3568_v39 = vor.u32 %v4379_v37, %v3567_v36  ;;  %v3575_v41 = vld [vmem:[%s6032_s2 + $0xf8] sm:$0xf]  ;;  %v4407_v36 = vld [vmem:[#allocation2 + $0x1a8] sm:$0xff] }
 0x155   :  { %4549 = vrcp.f32 %v940_v51  ;;  %v952_v0 = vand.u32 2147483648, %v940_v51  ;;  %v950_v3 = vand.u32 2147483647, %v940_v51  ;;  %vm946_vm1 = vweird.f32 %v940_v51  ;;  %1477 = vmatpush.bf16.msra.mxu1 %v3616_v47  ;;  %v3555_v45 = vld [vmem:[%s6032_s2 + $0xd8] sm:$0xf] }
 0x156   :  { %4551 = vrcp.f32 %v959_v52  ;;  %v971_v15 = vand.u32 2147483648, %v959_v52  ;;  %vm965_vm5 = vweird.f32 %v959_v52  ;;  %v969_v18 = vand.u32 2147483647, %v959_v52  ;;  %v4375_v47 = vld [vmem:[%s6032_s2 + $0xdc] sm:$0xf] }
 0x157   :  { %v953_v8 = vor.u32 1.1754944e-38, %v952_v0  ;;  %vm951_vm3 = vcmp.eq.f32.partialorder %v950_v3, 8.507059e+37  ;;  %v3505_v0 = vld [vmem:[%s6033_s3 + $0x38] sm:$0xf0]  ;;  %v3495_v3 = vld [vmem:[%s6033_s3 + $0x20] sm:$0xf] }
 0x158   :  { %v972_v24 = vor.u32 1.1754944e-38, %v971_v15  ;;  %vm970_vm7 = vcmp.eq.f32.partialorder %v969_v18, 8.507059e+37 }
 0x159   :  { %v935_v55 = vpop.f32.mrf.mxu0 }
 0x15a   :  { %v4365_v55 = vld [vmem:[%s6033_s3 + $0x44] sm:$0xf0] }
 0x15b   :  { %v4550_v56 = vpop.eup %4549 }
 0x15c   :  { %v4552_v58 = vpop.eup %4551  ;;  %v942_v59 = vmul.f32 %v4550_v56, %v940_v51  ;;  %vm947_vm0 = vweird.f32 %v4550_v56  ;;  %v3521_v51 = vld [vmem:[%s6033_s3 + $0x58] sm:$0xf0] }
 0x15d   :  { %v961_v60 = vmul.f32 %v4552_v58, %v959_v52  ;;  %vm948_vm2 = vmor %vm946_vm1, %vm947_vm0  ;;  %vm966_vm4 = vweird.f32 %v4552_v58  ;;  %v3520_v52 = vor.u32 %v4367_v49, %v3519_v48  ;;  %v3524_v53 = vor.u32 %v4366_v50, %v3521_v51  ;;  %v3617_v48 = vld [vmem:[%s6032_s2 + $0x15c] sm:$0xf0]  ;;  %v3623_v49 = vld [vmem:[%s6032_s2 + $0x158] sm:$0xf] }
 0x15e   :  { %v943_v61 = vsub.f32 1.0, %v942_v59  ;;  %vm967_vm6 = vmor %vm965_vm5, %vm966_vm4  ;;  %v4392_v50 = vld [vmem:[%s6032_s2 + $0x160] sm:$0xf0]  ;;  %v3620_v51 = vor.u32 %v4390_v46, %v3617_v48 }
 0x15f   :  { %v962_v62 = vsub.f32 1.0, %v961_v60  ;;  %1239 = vmatpush.bf16.msrb.mxu3 %v3520_v52  ;;  %1252 = vmatpush.bf16.msra.mxu0 %v3524_v53  ;;  %v3503_v60 = vld [vmem:[%s6033_s3 + $0x30] sm:$0xf]  ;;  %v3624_v52 = vor.u32 %v4392_v50, %v3623_v49  ;;  %v3603_v53 = vld [vmem:[%s6032_s2 + $0x138] sm:$0xf] }
 0x160   :  { %v944_v2 = vmul.f32 %v4550_v56, %v943_v61  ;;  %v4363_v61 = vld [vmem:[%s6033_s3 + $0x34] sm:$0xf0]  ;;  %v4376_v46 = vld [vmem:[%s6032_s2 + $0xe0] sm:$0xf0]  ;;  %v3557_v49 = vld [vmem:[%s6032_s2 + $0xe4] sm:$0xf0] }
 0x161   :  { %v963_v4 = vmul.f32 %v4552_v58, %v962_v62  ;;  %v4362_v62 = vld [vmem:[%s6033_s3 + $0x34] sm:$0xf]  ;;  %v3504_v1 = vor.u32 %v4363_v61, %v3503_v60  ;;  %v4400_v60 = vld [vmem:[%s6032_s2 + $0x1a0] sm:$0xf0]  ;;  %v3556_v48 = vor.u32 %v4376_v46, %v3555_v45  ;;  %v3563_v50 = vld [vmem:[%s6032_s2 + $0xe0] sm:$0xf] }
 0x162   :  { %v945_v6 = vadd.f32 %v4550_v56, %v944_v2  ;;  %v3508_v2 = vor.u32 %v4362_v62, %v3505_v0 }
 0x163   :  { %v964_v12 = vadd.f32 %v4552_v58, %v963_v4  ;;  %v4361_v4 = vld [vmem:[%s6033_s3 + $0x24] sm:$0xf0] }
 0x164   :  { %v949_v10 = vsel %vm948_vm2, %v4550_v56, %v945_v6  ;;  %v4364_v56 = vld [vmem:[%s6033_s3 + $0x44] sm:$0xf]  ;;  %v3497_v6 = vld [vmem:[%s6033_s3 + $0x28] sm:$0xf0] }
 0x165   :  { %v954_v11 = vsel %vm951_vm3, %v953_v8, %v949_v10  ;;  %v968_v23 = vsel %vm967_vm6, %v4552_v58, %v964_v12  ;;  %v3512_v58 = vor.u32 %v4365_v55, %v3511_v54  ;;  %v3516_v59 = vor.u32 %v4364_v56, %v3513_v57  ;;  %v4359_v10 = vld [vmem:[%s6033_s3 + $0x14] sm:$0xf0]  ;;  %v4358_v12 = vld [vmem:[%s6033_s3 + $0x14] sm:$0xf]  ;;  %v4388_v54 = vld [vmem:[%s6032_s2 + $0x140] sm:$0xf0] }
 0x166   :  { %v976_v14 = vmul.f32 %v975_v7, %v954_v11  ;;  %v973_v25 = vsel %vm970_vm7, %v972_v24, %v968_v23  ;;  %v3496_v7 = vor.u32 %v4361_v4, %v3495_v3  ;;  %v3500_v8 = vor.u32 %v4360_v5, %v3497_v6  ;;  %v4387_v55 = vld [vmem:[%s6032_s2 + $0x13c] sm:$0xf]  ;;  %v3605_v56 = vld [vmem:[%s6032_s2 + $0x144] sm:$0xf0]  ;;  %v3611_v57 = vld [vmem:[%s6032_s2 + $0x140] sm:$0xf] }
 0x167   :  { %v979_v26 = vsub.f32 1.0, %v973_v25  ;;  %1240 = vmatpush.bf16.msrb.mxu3 %v3512_v58  ;;  %1253 = vmatpush.bf16.msra.mxu0 %v3516_v59  ;;  %v998_v11 = vperm.slane %v5029_v31, 3  ;;  %v3479_v25 = vld [vmem:[%s6033_s3] sm:$0xf]  ;;  %v4389_v58 = vld [vmem:[%s6032_s2 + $0x148] sm:$0xf0]  ;;  %v3604_v61 = vor.u32 %v4388_v54, %v3603_v53  ;;  %v3608_v0 = vor.u32 %v4387_v55, %v3605_v56 }
 0x168   :  { %v977_v22 = vadd.f32 %v976_v14, %v934_v13  ;;  %v3489_v13 = vld [vmem:[%s6033_s3 + $0x18] sm:$0xf0]  ;;  %v3488_v14 = vor.u32 %v4359_v10, %v3487_v9  ;;  %v3651_v59 = vld [vmem:[%s6032_s2 + $0x198] sm:$0xf]  ;;  %v4385_v3 = vld [vmem:[%s6032_s2 + $0x128] sm:$0xf0] }
 0x169   :  { %v3492_v18 = vor.u32 %v4358_v12, %v3489_v13  ;;  %v3652_v62 = vor.u32 %v4400_v60, %v3651_v59  ;;  %v4384_v4 = vld [vmem:[%s6032_s2 + $0x124] sm:$0xf]  ;;  %v3593_v5 = vld [vmem:[%s6032_s2 + $0x12c] sm:$0xf0]  ;;  %v3599_v6 = vld [vmem:[%s6032_s2 + $0x128] sm:$0xf]  ;;  %1478 = vmatpush.bf16.msra.mxu1 %v3604_v61 }
 0x16a   :  { %4553 = vtanh.f32 %v977_v22  ;;  %v4397_v10 = vld [vmem:[%s6032_s2 + $0x188] sm:$0xf0]  ;;  %v3579_v13 = vld [vmem:[%s6032_s2 + $0x108] sm:$0xf]  ;;  %v3543_v54 = vld [vmem:[%s6032_s2 + $0xc0] sm:$0xf] }
 0x16b   :  { %1241 = vmatpush.bf16.msrb.mxu3 %v3504_v1  ;;  %1254 = vmatpush.bf16.msra.mxu0 %v3508_v2  ;;  %v3612_v1 = vor.u32 %v4389_v58, %v3611_v57  ;;  %v3591_v2 = vld [vmem:[%s6032_s2 + $0x120] sm:$0xf]  ;;  %v4373_v55 = vld [vmem:[%s6032_s2 + $0xc8] sm:$0xf0]  ;;  %v4372_v56 = vld [vmem:[%s6032_s2 + $0xc4] sm:$0xf] }
 0x16c   :  { %1495 = vmatpush.bf16.msra.mxu2 %v3652_v62  ;;  %v3592_v9 = vor.u32 %v4385_v3, %v3591_v2  ;;  %v3544_v57 = vor.u32 %v4373_v55, %v3543_v54  ;;  %v3545_v58 = vld [vmem:[%s6032_s2 + $0xcc] sm:$0xf0]  ;;  %v3551_v59 = vld [vmem:[%s6032_s2 + $0xc8] sm:$0xf]  ;;  %v4374_v60 = vld [vmem:[%s6032_s2 + $0xd0] sm:$0xf0] }
 0x16d   :  { %v3548_v61 = vor.u32 %v4372_v56, %v3545_v58  ;;  %v3552_v62 = vor.u32 %v4374_v60, %v3551_v59  ;;  %v4396_v3 = vld [vmem:[%s6032_s2 + $0x184] sm:$0xf] }
 0x16e   :  { %1479 = vmatpush.bf16.msra.mxu1 %v3592_v9  ;;  %v3647_v9 = vld [vmem:[%s6032_s2 + $0x188] sm:$0xf]  ;;  %v4402_v56 = vld [vmem:[#allocation2 + $0x180] sm:$0xff] }
 0x16f   :  { %1242 = vmatpush.bf16.msrb.mxu3 %v3496_v7  ;;  %1255 = vmatpush.bf16.msra.mxu0 %v3500_v8  ;;  %v4386_v7 = vld [vmem:[%s6032_s2 + $0x130] sm:$0xf0]  ;;  %v3639_v8 = vld [vmem:[%s6032_s2 + $0x180] sm:$0xf] }
 0x170   :  { %v4554_v29 = vpop.eup %4553  ;;  %v3600_v12 = vor.u32 %v4386_v7, %v3599_v6  ;;  %v4401_v7 = vld [vmem:[%s6032_s2 + $0x1a8] sm:$0xf0] }
 0x171   :  { %v980_v32 = vmul.f32 %v4554_v29, %v979_v26  ;;  %v4357_v26 = vld [vmem:[%s6033_s3 + $0x4] sm:$0xf0]  ;;  %v4356_v29 = vld [vmem:[%s6033_s3 + $0x4] sm:$0xf] }
 0x173   :  { %v997_v33 = vpack.c.bf16 %v980_v32, %v980_v32  ;;  %1243 = vmatpush.bf16.msrb.mxu3 %v3488_v14  ;;  %1256 = vmatpush.bf16.msra.mxu0 %v3492_v18  ;;  %v3480_v32 = vor.u32 %v4357_v26, %v3479_v25  ;;  %v4382_v14 = vld [vmem:[%s6032_s2 + $0x110] sm:$0xf0]  ;;  %v3640_v18 = vor.u32 %v4397_v10, %v3639_v8 }
 0x174   :  { %v4398_v10 = vld [vmem:[%s6032_s2 + $0x190] sm:$0xf0] }
 0x175   :  { %1055 = vmatmul.bf16.vlgmr.msrb.gmra.mxu1 %v997_v33  ;;  %v3481_v33 = vld [vmem:[%s6033_s3 + $0x8] sm:$0xf0]  ;;  %1496 = vmatpush.bf16.msra.mxu2 %v3640_v18 }
 0x176   :  { %v3484_v34 = vor.u32 %v4356_v29, %v3481_v33  ;;  %v1078_v29 = vperm.slane %v5029_v31, 4 }
 0x177   :  { %1244 = vmatpush.bf16.msrb.mxu3 %v3480_v32 }
 0x178   :  { %1257 = vmatpush.bf16.msra.mxu0 %v3484_v34 }
 0x17b   :  { %1502 = vmatpush.bf16.msra.mxu3 %v3632_v42  ;;  %v4380_v42 = vld [vmem:[%s6032_s2 + $0x100] sm:$0xf0] }
 0x17c   :  { %1528 = vmatpush.bf16.msrb.mxu0 %v3636_v43  ;;  %v3572_v43 = vor.u32 %v4378_v38, %v3569_v40  ;;  %v3576_v44 = vor.u32 %v4380_v42, %v3575_v41  ;;  %v4406_v41 = vld [vmem:[#allocation2 + $0x1a0] sm:$0xff] }
 0x17f   :  { %1503 = vmatpush.bf16.msra.mxu3 %v3620_v51  ;;  %v4377_v51 = vld [vmem:[%s6032_s2 + $0xe8] sm:$0xf0] }
 0x180   :  { %1529 = vmatpush.bf16.msrb.mxu0 %v3624_v52  ;;  %v3560_v52 = vor.u32 %v4375_v47, %v3557_v49  ;;  %v3564_v53 = vor.u32 %v4377_v51, %v3563_v50  ;;  %v4404_v49 = vld [vmem:[#allocation2 + $0x190] sm:$0xff]  ;;  %v1310_v50 = vperm.slane %v5113_v30, 6  ;;  %v4403_v51 = vld [vmem:[#allocation2 + $0x188] sm:$0xff] }
 0x183   :  { %1504 = vmatpush.bf16.msra.mxu3 %v3608_v0  ;;  %v4399_v0 = vld [vmem:[%s6032_s2 + $0x19c] sm:$0xf] }
 0x184   :  { %1530 = vmatpush.bf16.msrb.mxu0 %v3612_v1  ;;  %v3653_v1 = vld [vmem:[%s6032_s2 + $0x1a4] sm:$0xf0] }
 0x185   :  { %v3656_v2 = vor.u32 %v4399_v0, %v3653_v1 }
 0x188   :  { %1531 = vmatpush.bf16.msrb.mxu0 %v3600_v12  ;;  %v380_v12 = vperm.slane %v5113_v30, 5  ;;  %v4416_v30 = vld [vmem:[#allocation2 + $0x1f0] sm:$0xff] }
 0x1f2   :  { %v1056_v15 = vpop.f32.mrf.mxu1 }
 0x1f3   :  { %v1057_v21 = vadd.f32 %v1056_v15, %v998_v11  ;;  %v3596_v11 = vor.u32 %v4384_v4, %v3593_v5  ;;  %v4381_v15 = vld [vmem:[%s6032_s2 + $0x10c] sm:$0xf]  ;;  %v3641_v4 = vld [vmem:[%s6032_s2 + $0x18c] sm:$0xf0]  ;;  %v3659_v5 = vld [vmem:[%s6032_s2 + $0x1a0] sm:$0xf] }
 0x1f4   :  { %v3644_v6 = vor.u32 %v4396_v3, %v3641_v4  ;;  %v3660_v8 = vor.u32 %v4401_v7, %v3659_v5 }
 0x1f5   :  { %v1060_v22 = vmax.f32 %v1057_v21, 0.0  ;;  %v3581_v21 = vld [vmem:[%s6032_s2 + $0x114] sm:$0xf0]  ;;  %1505 = vmatpush.bf16.msra.mxu3 %v3596_v11  ;;  %v3648_v11 = vor.u32 %v4398_v10, %v3647_v9 }
 0x1f6   :  { %v3584_v25 = vor.u32 %v4381_v15, %v3581_v21  ;;  %v379_v15 = vperm.slane %v5029_v31, 5 }
 0x1f7   :  { %v1077_v23 = vpack.c.bf16 %v1060_v22, %v1060_v22  ;;  %v3587_v22 = vld [vmem:[%s6032_s2 + $0x110] sm:$0xf] }
 0x1f9   :  { %1135 = vmatmul.bf16.vlgmr.msrb.gmra.mxu2 %v1077_v23  ;;  %v4383_v23 = vld [vmem:[%s6032_s2 + $0x118] sm:$0xf0]  ;;  %1506 = vmatpush.bf16.msra.mxu3 %v3584_v25 }
 0x1fa   :  { %v1058_v24 = vpop.f32.mrf.mxu1  ;;  %v3588_v26 = vor.u32 %v4383_v23, %v3587_v22  ;;  %1521 = vmatpush.bf16.msrb.mxu2 %v3656_v2  ;;  %v471_v22 = vadd.f32 %v5098_v16, %v379_v15  ;;  %v1309_v16 = vperm.slane %v5029_v31, 6  ;;  %v4414_v15 = vld [vmem:[#allocation2 + $0x1e0] sm:$0xff] }
 0x1fb   :  { %v3580_v24 = vor.u32 %v4382_v14, %v3579_v13  ;;  %v484_v13 = vadd.f32 %v5100_v17, %v380_v12 }
 0x1fc   :  { %1532 = vmatpush.bf16.msrb.mxu0 %v3588_v26 }
 0x1fd   :  { %1480 = vmatpush.bf16.msra.mxu1 %v3580_v24  ;;  %1507 = vmatpush.bf16.msra.mxu3 %v3572_v43 }
 0x1fe   :  { %1522 = vmatpush.bf16.msrb.mxu2 %v3644_v6 }
 0x200   :  { %1533 = vmatpush.bf16.msrb.mxu0 %v3576_v44  ;;  %v4405_v44 = vld [vmem:[#allocation2 + $0x198] sm:$0xff] }
 0x201   :  { %1481 = vmatpush.bf16.msra.mxu1 %v3568_v39  ;;  %1508 = vmatpush.bf16.msra.mxu3 %v3560_v52 }
 0x204   :  { %1534 = vmatpush.bf16.msrb.mxu0 %v3564_v53 }
 0x205   :  { %1482 = vmatpush.bf16.msra.mxu1 %v3556_v48  ;;  %1509 = vmatpush.bf16.msra.mxu3 %v3548_v61  ;;  %v4417_v61 = vld [vmem:[#allocation2 + $0x1f8] sm:$0xff] }
 0x208   :  { %1535 = vmatpush.bf16.msrb.mxu0 %v3552_v62 }
 0x209   :  { %1483 = vmatpush.bf16.msra.mxu1 %v3544_v57 }
 0x20d   :  { %1547 = vmatpush.bf16.msrb.mxu1 %v3660_v8  ;;  %v4415_v8 = vld [vmem:[#allocation2 + $0x1e8] sm:$0xff] }
 0x211   :  { %1548 = vmatpush.bf16.msrb.mxu1 %v3648_v11  ;;  %v1311_v11 = vperm.slane %v5120_v63, 6  ;;  %v4412_v63 = vld [vmem:[#allocation2 + $0x1d0] sm:$0xff] }
 0x27c   :  { %v1136_v32 = vpop.f32.mrf.mxu2 }
 0x27d   :  { %v5324_v33 = vadd.f32 %v1136_v32, %v1078_v29 }
 0x27f   :  { %v1156_v34 = vpack.c.bf16 %v5324_v33, %v5324_v33 }
 0x281   :  { %1245 = vmatmul.bf16.vlgmr.msrb.gmra.mxu3 %v1156_v34  ;;  %1258 = vmatmul.bf16.vlgmr.msra.gmra.mxu0 %v1156_v34  ;;  %v4409_v34 = vld [vmem:[#allocation2 + $0x1b8] sm:$0xff] }
 0x282   :  { %1743 = vmatpush.bf16.msrb.mxu3 %v4417_v61 }
 0x284   :  { %v1138_v35 = vpop.f32.mrf.mxu2 }
 0x285   :  { %v4408_v35 = vld [vmem:[#allocation2 + $0x1b0] sm:$0xff] }
 0x286   :  { %1744 = vmatpush.bf16.msrb.mxu3 %v4416_v30  ;;  %v4426_v30 = vld [vmem:[%s6033_s3 + $0xc4] sm:$0xf] }
 0x28a   :  { %1745 = vmatpush.bf16.msrb.mxu3 %v4415_v8 }
 0x28e   :  { %1746 = vmatpush.bf16.msrb.mxu3 %v4414_v15  ;;  %v5492_v15 = vld [vmem:[%s6034_s4 + $0x18] sm:$0xff] }
 0x2fe   :  { %v1259_v14 = vpop.f32.mrf.mxu0 }
 0x2ff   :  { %v1264_v18 = vadd.f32 %v1259_v14, %v484_v13  ;;  %v1592_v13 = vperm.slane %v5029_v31, 7 }
 0x301   :  { %v1266_v21 = vmax.f32 %v1264_v18, 0.0 }
 0x303   :  { %v1308_v23 = vpack.c.bf16 %v1266_v21, %v1266_v21 }
 0x304   :  { %v1246_v24 = vpop.f32.mrf.mxu3 }
 0x305   :  { %v1263_v25 = vadd.f32 %v1246_v24, %v471_v22  ;;  %3661 = vmatmul.msk.bf16.vlgmr.msra.gmra.mxu2 %vm1472_vm8, %v1308_v23 }
 0x306   :  { %v1261_v26 = vpop.f32.mrf.mxu0  ;;  %1664 = vmatpush.bf16.msra.mxu2 %v4409_v34 }
 0x307   :  { %v1265_v29 = vmax.f32 %v1263_v25, 0.0 }
 0x309   :  { %v1307_v32 = vpack.c.bf16 %v1265_v29, %v1265_v29 }
 0x30a   :  { %1665 = vmatpush.bf16.msra.mxu2 %v4408_v35 }
 0x30b   :  { %1484 = vmatmul.bf16.vlgmr.msra.gmra.mxu1 %v1307_v32  ;;  %1510 = vmatmul.bf16.vlgmr.msra.gmra.mxu3 %v1307_v32 }
 0x30c   :  { %1536 = vmatmul.bf16.vlgmr.msrb.gmra.mxu0 %v1307_v32  ;;  %v1248_v17 = vpop.f32.mrf.mxu3 }
 0x30e   :  { %1666 = vmatpush.bf16.msra.mxu2 %v4407_v36 }
 0x312   :  { %1667 = vmatpush.bf16.msra.mxu2 %v4406_v41 }
 0x315   :  { %3662 = vmatmul.msk.bf16.vlgmr.msrb.gmra.mxu2 %vm1472_vm8, %v1308_v23 }
 0x316   :  { %1668 = vmatpush.bf16.msra.mxu2 %v4405_v44  ;;  %v3788_v44 = vld [vmem:[%s6033_s3 + $0xf0] sm:$0xf] }
 0x31a   :  { %1669 = vmatpush.bf16.msra.mxu2 %v4404_v49  ;;  %v3780_v49 = vld [vmem:[%s6033_s3 + $0xe0] sm:$0xf] }
 0x31b   :  { %3663 = vmatmul.msk.bf16.vlgmr.msrb.gmra.mxu1 %vm1472_vm8, %v1308_v23  ;;  %v4413_v23 = vld [vmem:[#allocation2 + $0x1d8] sm:$0xff] }
 0x31c   :  { %1747 = vmatpush.bf16.msrb.mxu3 %v4413_v23  ;;  %v1615_v23 = vperm.slane %v5492_v15, 0 }
 0x31e   :  { %1670 = vmatpush.bf16.msra.mxu2 %v4403_v51 }
 0x320   :  { %1748 = vmatpush.bf16.msrb.mxu3 %v4412_v63 }
 0x322   :  { %1671 = vmatpush.bf16.msra.mxu2 %v4402_v56  ;;  %v3772_v56 = vld [vmem:[%s6033_s3 + $0xd0] sm:$0xf] }
 0x388   :  { %v1485_v37 = vpop.f32.mrf.mxu1  ;;  %v1498_v38 = vpop.f32.mrf.mxu2 }
 0x389   :  { %v1486_v39 = vadd.f32 %v1485_v37, %v1309_v16  ;;  %v1537_v40 = vpop.f32.mrf.mxu0 }
 0x38a   :  { %v1538_v21 = vadd.f32 %v1537_v40, %v1311_v11  ;;  %v4423_v11 = vld [vmem:[%s6033_s3 + $0xa4] sm:$0xf0] }
 0x38b   :  { %v1499_v42 = vadd.f32 %v1498_v38, %v1486_v39 }
 0x38d   :  { %v3664_v43 = vmul.f32 -1.442695, %v1499_v42  ;;  %v4411_v42 = vld [vmem:[#allocation2 + $0x1c8] sm:$0xff] }
 0x38e   :  { %v1511_v45 = vpop.f32.mrf.mxu3  ;;  %1749 = vmatpush.bf16.msrb.mxu3 %v4411_v42  ;;  %v4455_v42 = vld [vmem:[%s6032_s2 + $0x25c] sm:$0xf] }
 0x38f   :  { %4555 = vpow2.f32 %v3664_v43  ;;  %v1512_v55 = vadd.f32 %v1511_v45, %v1310_v50  ;;  %v4410_v43 = vld [vmem:[#allocation2 + $0x1c0] sm:$0xff]  ;;  %v4433_v45 = vld [vmem:[%s6033_s3 + $0xf4] sm:$0xf0]  ;;  %v4431_v50 = vld [vmem:[%s6033_s3 + $0xe4] sm:$0xf0] }
 0x390   :  { %v1487_v46 = vpop.f32.mrf.mxu1  ;;  %v1500_v47 = vpop.f32.mrf.mxu2 }
 0x391   :  { %v1539_v48 = vpop.f32.mrf.mxu0  ;;  %v4432_v46 = vld [vmem:[%s6033_s3 + $0xf4] sm:$0xf]  ;;  %v3789_v47 = vor.u32 %v4433_v45, %v3788_v44  ;;  %v3882_v44 = vld [vmem:[%s6032_s2 + $0x264] sm:$0xf0]  ;;  %v3888_v45 = vld [vmem:[%s6032_s2 + $0x260] sm:$0xf] }
 0x392   :  { %1750 = vmatpush.bf16.msrb.mxu3 %v4410_v43  ;;  %v3790_v48 = vld [vmem:[%s6033_s3 + $0xf8] sm:$0xf0] }
 0x393   :  { %v3793_v51 = vor.u32 %v4432_v46, %v3790_v48  ;;  %1854 = vmatpush.bf16.msra.mxu1 %v3789_v47  ;;  %v4457_v46 = vld [vmem:[%s6032_s2 + $0x268] sm:$0xf0]  ;;  %v3885_v47 = vor.u32 %v4455_v42, %v3882_v44 }
 0x394   :  { %v3889_v48 = vor.u32 %v4457_v46, %v3888_v45  ;;  %v3808_v46 = vld [vmem:[%s6032_s2 + $0x1c8] sm:$0xf] }
 0x395   :  { %v4556_v52 = vpop.eup %4555  ;;  %1867 = vmatpush.bf16.msra.mxu0 %v3793_v51  ;;  %v4452_v51 = vld [vmem:[%s6032_s2 + $0x244] sm:$0xf] }
 0x396   :  { %v1557_v53 = vadd.f32 1.0, %v4556_v52  ;;  %v1513_v54 = vpop.f32.mrf.mxu3  ;;  %v4430_v52 = vld [vmem:[%s6033_s3 + $0xe4] sm:$0xf] }
 0x397   :  { %v3781_v54 = vor.u32 %v4431_v50, %v3780_v49  ;;  %v3868_v49 = vld [vmem:[%s6032_s2 + $0x240] sm:$0xf]  ;;  %v4453_v50 = vld [vmem:[%s6032_s2 + $0x248] sm:$0xf0] }
 0x398   :  { %4557 = vrcp.f32 %v1557_v53  ;;  %v1524_v57 = vpop.f32.mrf.mxu2  ;;  %v1550_v58 = vpop.f32.mrf.mxu1  ;;  %v1569_v4 = vand.u32 2147483648, %v1557_v53  ;;  %v1567_v7 = vand.u32 2147483647, %v1557_v53  ;;  %vm1563_vm10 = vweird.f32 %v1557_v53 }
 0x399   :  { %v1525_v59 = vadd.f32 %v1524_v57, %v1512_v55  ;;  %v1551_v25 = vadd.f32 %v1550_v58, %v1538_v21  ;;  %v4429_v57 = vld [vmem:[%s6033_s3 + $0xd4] sm:$0xf0]  ;;  %v4428_v58 = vld [vmem:[%s6033_s3 + $0xd4] sm:$0xf]  ;;  %1855 = vmatpush.bf16.msra.mxu1 %v3781_v54  ;;  %v3740_v21 = vld [vmem:[%s6033_s3 + $0x90] sm:$0xf] }
 0x39a   :  { %v1570_v12 = vor.u32 1.1754944e-38, %v1569_v4  ;;  %vm1568_vm12 = vcmp.eq.f32.partialorder %v1567_v7, 8.507059e+37  ;;  %v3756_v4 = vld [vmem:[%s6033_s3 + $0xb0] sm:$0xf]  ;;  %v3758_v7 = vld [vmem:[%s6033_s3 + $0xb8] sm:$0xf0] }
 0x39b   :  { %v3665_v60 = vmul.f32 -1.442695, %v1525_v59  ;;  %v3774_v59 = vld [vmem:[%s6033_s3 + $0xd8] sm:$0xf0]  ;;  %v3876_v54 = vld [vmem:[%s6032_s2 + $0x248] sm:$0xf] }
 0x39c   :  { %v3777_v61 = vor.u32 %v4428_v58, %v3774_v59  ;;  %v3856_v58 = vld [vmem:[%s6032_s2 + $0x228] sm:$0xf]  ;;  %v4450_v59 = vld [vmem:[%s6032_s2 + $0x230] sm:$0xf0] }
 0x39d   :  { %4559 = vpow2.f32 %v3665_v60  ;;  %v3773_v60 = vor.u32 %v4429_v57, %v3772_v56 }
 0x39e   :  { %v4558_v62 = vpop.eup %4557 }
 0x39f   :  { %v1559_v0 = vmul.f32 %v4558_v62, %v1557_v53  ;;  %vm1564_vm9 = vweird.f32 %v4558_v62  ;;  %v3782_v53 = vld [vmem:[%s6033_s3 + $0xe8] sm:$0xf0]  ;;  %1856 = vmatpush.bf16.msra.mxu1 %v3773_v60 }
 0x3a0   :  { %v1526_v1 = vpop.f32.mrf.mxu2  ;;  %v1552_v2 = vpop.f32.mrf.mxu1  ;;  %vm1565_vm11 = vmor %vm1563_vm10, %vm1564_vm9  ;;  %v3785_v55 = vor.u32 %v4430_v52, %v3782_v53  ;;  %v3869_v52 = vor.u32 %v4453_v50, %v3868_v49  ;;  %v3870_v53 = vld [vmem:[%s6032_s2 + $0x24c] sm:$0xf0]  ;;  %v4449_v60 = vld [vmem:[%s6032_s2 + $0x22c] sm:$0xf] }
 0x3a1   :  { %v1560_v3 = vsub.f32 1.0, %v1559_v0  ;;  %v4427_v0 = vld [vmem:[%s6033_s3 + $0xc4] sm:$0xf0]  ;;  %v3766_v1 = vld [vmem:[%s6033_s3 + $0xc8] sm:$0xf0]  ;;  %v3873_v56 = vor.u32 %v4452_v51, %v3870_v53 }
 0x3a2   :  { %1868 = vmatpush.bf16.msra.mxu0 %v3785_v55  ;;  %v4454_v55 = vld [vmem:[%s6032_s2 + $0x250] sm:$0xf0]  ;;  %v3810_v49 = vld [vmem:[%s6032_s2 + $0x1d4] sm:$0xf0]  ;;  %v3816_v50 = vld [vmem:[%s6032_s2 + $0x1d0] sm:$0xf] }
 0x3a3   :  { %v4560_v5 = vpop.eup %4559  ;;  %v1561_v6 = vmul.f32 %v4558_v62, %v1560_v3  ;;  %v3769_v3 = vor.u32 %v4426_v30, %v3766_v1  ;;  %v3877_v57 = vor.u32 %v4454_v55, %v3876_v54  ;;  %v3857_v30 = vor.u32 %v4450_v59, %v3856_v58  ;;  %v3844_v1 = vld [vmem:[%s6032_s2 + $0x210] sm:$0xf]  ;;  %v4439_v51 = vld [vmem:[%s6032_s2 + $0x1d8] sm:$0xf0]  ;;  %v3798_v58 = vld [vmem:[%s6032_s2 + $0x1bc] sm:$0xf0] }
 0x3a4   :  { %v1576_v9 = vadd.f32 1.0, %v4560_v5  ;;  %v4425_v5 = vld [vmem:[%s6033_s3 + $0xb4] sm:$0xf0]  ;;  %v3817_v53 = vor.u32 %v4439_v51, %v3816_v50  ;;  %v3796_v54 = vld [vmem:[%s6032_s2 + $0x1b0] sm:$0xf] }
 0x3a5   :  { %v1562_v10 = vadd.f32 %v4558_v62, %v1561_v6  ;;  %v4424_v6 = vld [vmem:[%s6033_s3 + $0xb4] sm:$0xf]  ;;  %v3757_v8 = vor.u32 %v4425_v5, %v3756_v4  ;;  %v4435_v55 = vld [vmem:[%s6032_s2 + $0x1b8] sm:$0xf0]  ;;  %v3804_v59 = vld [vmem:[%s6032_s2 + $0x1b8] sm:$0xf] }
 0x3a6   :  { %4561 = vrcp.f32 %v1576_v9  ;;  %v1588_v17 = vand.u32 2147483648, %v1576_v9  ;;  %v1586_v31 = vand.u32 2147483647, %v1576_v9  ;;  %vm1582_vm14 = vweird.f32 %v1576_v9  ;;  %1869 = vmatpush.bf16.msra.mxu0 %v3777_v61  ;;  %v3858_v61 = vld [vmem:[%s6032_s2 + $0x234] sm:$0xf0] }
 0x3a7   :  { %v1566_v14 = vsel %vm1565_vm11, %v4558_v62, %v1562_v10  ;;  %v3764_v62 = vld [vmem:[%s6033_s3 + $0xc0] sm:$0xf]  ;;  %v4446_v5 = vld [vmem:[%s6032_s2 + $0x214] sm:$0xf] }
 0x3a8   :  { %v1571_v18 = vsel %vm1568_vm12, %v1570_v12, %v1566_v14  ;;  %v1589_v16 = vor.u32 1.1754944e-38, %v1588_v17  ;;  %vm1587_vm0 = vcmp.eq.f32.partialorder %v1586_v31, 8.507059e+37  ;;  %v3765_v2 = vor.u32 %v4427_v0, %v3764_v62  ;;  %v3748_v10 = vld [vmem:[%s6033_s3 + $0xa0] sm:$0xf]  ;;  %v4422_v12 = vld [vmem:[%s6033_s3 + $0xa4] sm:$0xf] }
 0x3a9   :  { %v1593_v22 = vmul.f32 %v1592_v13, %v1571_v18  ;;  %v3750_v13 = vld [vmem:[%s6033_s3 + $0xa8] sm:$0xf0]  ;;  %v3749_v14 = vor.u32 %v4423_v11, %v3748_v10  ;;  %v3864_v62 = vld [vmem:[%s6032_s2 + $0x230] sm:$0xf]  ;;  %v4451_v0 = vld [vmem:[%s6032_s2 + $0x238] sm:$0xf0] }
 0x3aa   :  { %1857 = vmatpush.bf16.msra.mxu1 %v3765_v2  ;;  %1870 = vmatpush.bf16.msra.mxu0 %v3769_v3  ;;  %v3753_v18 = vor.u32 %v4422_v12, %v3750_v13  ;;  %v4447_v2 = vld [vmem:[%s6032_s2 + $0x218] sm:$0xf0]  ;;  %v3861_v3 = vor.u32 %v4449_v60, %v3858_v61  ;;  %v3865_v4 = vor.u32 %v4451_v0, %v3864_v62  ;;  %v4448_v10 = vld [vmem:[%s6032_s2 + $0x220] sm:$0xf0]  ;;  %v3832_v13 = vld [vmem:[%s6032_s2 + $0x1f8] sm:$0xf] }
 0x3ab   :  { %v1594_v29 = vadd.f32 %v1593_v22, %v1551_v25  ;;  %v4421_v22 = vld [vmem:[%s6033_s3 + $0x94] sm:$0xf0]  ;;  %v3742_v25 = vld [vmem:[%s6033_s3 + $0x98] sm:$0xf0]  ;;  %v3845_v12 = vor.u32 %v4447_v2, %v3844_v1  ;;  %v4436_v60 = vld [vmem:[%s6032_s2 + $0x1c0] sm:$0xf0] }
 0x3ac   :  { %v4562_v24 = vpop.eup %4561  ;;  %v3805_v62 = vor.u32 %v4436_v60, %v3804_v59  ;;  %v4461_v0 = vld [vmem:[%s6032_s2 + $0x28c] sm:$0xf]  ;;  %v4458_v1 = vld [vmem:[%s6032_s2 + $0x274] sm:$0xf] }
 0x3ad   :  { %v1578_v26 = vmul.f32 %v4562_v24, %v1576_v9  ;;  %vm1583_vm13 = vweird.f32 %v4562_v24  ;;  %4563 = vtanh.f32 %v1594_v29  ;;  %v3761_v9 = vor.u32 %v4424_v6, %v3758_v7  ;;  %v3904_v6 = vld [vmem:[%s6032_s2 + $0x288] sm:$0xf]  ;;  %v4462_v7 = vld [vmem:[%s6032_s2 + $0x290] sm:$0xf0] }
 0x3ae   :  { %vm1584_vm15 = vmor %vm1582_vm14, %vm1583_vm13  ;;  %1858 = vmatpush.bf16.msra.mxu1 %v3757_v8  ;;  %v3846_v8 = vld [vmem:[%s6032_s2 + $0x21c] sm:$0xf0]  ;;  %v3905_v11 = vor.u32 %v4462_v7, %v3904_v6  ;;  %v3900_v7 = vld [vmem:[%s6032_s2 + $0x278] sm:$0xf] }
 0x3af   :  { %v1579_v32 = vsub.f32 1.0, %v1578_v26  ;;  %1871 = vmatpush.bf16.msra.mxu0 %v3761_v9  ;;  %v3741_v26 = vor.u32 %v4421_v22, %v3740_v21  ;;  %v3852_v9 = vld [vmem:[%s6032_s2 + $0x218] sm:$0xf]  ;;  %v4443_v22 = vld [vmem:[%s6032_s2 + $0x1fc] sm:$0xf] }
 0x3b0   :  { %2111 = vmatpush.bf16.msra.mxu3 %v3905_v11  ;;  %v3853_v21 = vor.u32 %v4448_v10, %v3852_v9  ;;  %v5707_v11 = vld [vmem:[%s6034_s4 + $0x20] sm:$0xff] }
 0x3b1   :  { %v1580_v34 = vmul.f32 %v4562_v24, %v1579_v32 }
 0x3b2   :  { %1859 = vmatpush.bf16.msra.mxu1 %v3749_v14  ;;  %v4444_v14 = vld [vmem:[%s6032_s2 + $0x200] sm:$0xf0] }
 0x3b3   :  { %v1581_v35 = vadd.f32 %v4562_v24, %v1580_v34  ;;  %v4564_v39 = vpop.eup %4563  ;;  %1872 = vmatpush.bf16.msra.mxu0 %v3753_v18  ;;  %v3849_v18 = vor.u32 %v4446_v5, %v3846_v8  ;;  %v4463_v5 = vld [vmem:[%s6032_s2 + $0x298] sm:$0xf0]  ;;  %v4460_v8 = vld [vmem:[%s6032_s2 + $0x280] sm:$0xf0] }
 0x3b4   :  { %v3901_v10 = vor.u32 %v4460_v8, %v3900_v7 }
 0x3b5   :  { %v1585_v36 = vsel %vm1584_vm15, %v4562_v24, %v1581_v35  ;;  %v4420_v24 = vld [vmem:[%s6033_s3 + $0x94] sm:$0xf]  ;;  %v3732_v35 = vld [vmem:[%s6033_s3 + $0x80] sm:$0xf] }
 0x3b6   :  { %v1590_v37 = vsel %vm1587_vm0, %v1589_v16, %v1585_v36  ;;  %v3745_v32 = vor.u32 %v4420_v24, %v3742_v25  ;;  %1860 = vmatpush.bf16.msra.mxu1 %v3741_v26  ;;  %v4419_v16 = vld [vmem:[%s6033_s3 + $0x84] sm:$0xf0]  ;;  %v4418_v36 = vld [vmem:[%s6033_s3 + $0x84] sm:$0xf]  ;;  %v3892_v24 = vld [vmem:[%s6032_s2 + $0x270] sm:$0xf] }
 0x3b7   :  { %v1596_v38 = vsub.f32 1.0, %v1590_v37  ;;  %v3733_v37 = vor.u32 %v4419_v16, %v3732_v35  ;;  %v3840_v25 = vld [vmem:[%s6032_s2 + $0x200] sm:$0xf]  ;;  %v4445_v26 = vld [vmem:[%s6032_s2 + $0x208] sm:$0xf0] }
 0x3b8   :  { %1873 = vmatpush.bf16.msra.mxu0 %v3745_v32  ;;  %v4441_v35 = vld [vmem:[%s6032_s2 + $0x1e8] sm:$0xf0]  ;;  %v4440_v16 = vld [vmem:[%s6032_s2 + $0x1e4] sm:$0xf] }
 0x3b9   :  { %v1597_v40 = vmul.f32 %v4564_v39, %v1596_v38  ;;  %v3734_v38 = vld [vmem:[%s6033_s3 + $0x88] sm:$0xf0] }
 0x3ba   :  { %v3737_v39 = vor.u32 %v4418_v36, %v3734_v38  ;;  %1861 = vmatpush.bf16.msra.mxu1 %v3733_v37  ;;  %v3822_v36 = vld [vmem:[%s6032_s2 + $0x1ec] sm:$0xf0]  ;;  %v3828_v37 = vld [vmem:[%s6032_s2 + $0x1e8] sm:$0xf]  ;;  %v4442_v38 = vld [vmem:[%s6032_s2 + $0x1f0] sm:$0xf0] }
 0x3bb   :  { %v1614_v41 = vpack.c.bf16 %v1597_v40, %v1597_v40  ;;  %v3880_v40 = vld [vmem:[%s6032_s2 + $0x258] sm:$0xf] }
 0x3bc   :  { %1874 = vmatpush.bf16.msra.mxu0 %v3737_v39 }
 0x3bd   :  { %1672 = vmatmul.bf16.vlgmr.msra.gmra.mxu2 %v1614_v41  ;;  %v4456_v41 = vld [vmem:[%s6032_s2 + $0x260] sm:$0xf0] }
 0x3be   :  { %v3881_v43 = vor.u32 %v4456_v41, %v3880_v40  ;;  %2118 = vmatpush.bf16.msrb.mxu1 %v3885_v47  ;;  %v3825_v40 = vor.u32 %v4440_v16, %v3822_v36  ;;  %v3829_v41 = vor.u32 %v4442_v38, %v3828_v37  ;;  %v4438_v47 = vld [vmem:[%s6032_s2 + $0x1d0] sm:$0xf0]  ;;  %v4469_v16 = vld [vmem:[#allocation2 + $0x228] sm:$0xff] }
 0x3c0   :  { %2092 = vmatpush.bf16.msrb.mxu2 %v3881_v43  ;;  %2144 = vmatpush.bf16.msrb.mxu0 %v3889_v48  ;;  %v4437_v48 = vld [vmem:[%s6032_s2 + $0x1cc] sm:$0xf] }
 0x3c2   :  { %2119 = vmatpush.bf16.msrb.mxu1 %v3873_v56  ;;  %v4434_v56 = vld [vmem:[%s6032_s2 + $0x1b4] sm:$0xf] }
 0x3c3   :  { %v3801_v61 = vor.u32 %v4434_v56, %v3798_v58  ;;  %v4479_v58 = vld [vmem:[#allocation2 + $0x278] sm:$0xff] }
 0x3c4   :  { %2093 = vmatpush.bf16.msrb.mxu2 %v3869_v52  ;;  %2145 = vmatpush.bf16.msrb.mxu0 %v3877_v57  ;;  %v3813_v52 = vor.u32 %v4437_v48, %v3810_v49  ;;  %v3797_v57 = vor.u32 %v4435_v55, %v3796_v54  ;;  %v4466_v48 = vld [vmem:[#allocation2 + $0x210] sm:$0xff]  ;;  %v4465_v49 = vld [vmem:[#allocation2 + $0x208] sm:$0xff] }
 0x3c6   :  { %2120 = vmatpush.bf16.msrb.mxu1 %v3861_v3  ;;  %v3894_v3 = vld [vmem:[%s6032_s2 + $0x27c] sm:$0xf0] }
 0x3c7   :  { %v3897_v9 = vor.u32 %v4458_v1, %v3894_v3  ;;  %v5723_v3 = vld [vmem:[%s6034_s4 + $0x28] sm:$0xff] }
 0x3c8   :  { %2094 = vmatpush.bf16.msrb.mxu2 %v3857_v30  ;;  %2146 = vmatpush.bf16.msrb.mxu0 %v3865_v4  ;;  %v3906_v30 = vld [vmem:[%s6032_s2 + $0x294] sm:$0xf0]  ;;  %v3912_v4 = vld [vmem:[%s6032_s2 + $0x290] sm:$0xf] }
 0x3c9   :  { %v3909_v2 = vor.u32 %v4461_v0, %v3906_v30  ;;  %v3913_v6 = vor.u32 %v4463_v5, %v3912_v4 }
 0x3ca   :  { %2121 = vmatpush.bf16.msrb.mxu1 %v3849_v18 }
 0x3cc   :  { %2095 = vmatpush.bf16.msrb.mxu2 %v3845_v12  ;;  %2147 = vmatpush.bf16.msrb.mxu0 %v3853_v21  ;;  %v503_v12 = vperm.slane %v5492_v15, 1 }
 0x440   :  { %v1673_v29 = vpop.f32.mrf.mxu2 }
 0x441   :  { %v1674_v63 = vadd.f32 %v1673_v29, %v1615_v23  ;;  %v3834_v23 = vld [vmem:[%s6032_s2 + $0x204] sm:$0xf0]  ;;  %v4459_v29 = vld [vmem:[%s6032_s2 + $0x278] sm:$0xf0] }
 0x442   :  { %v3893_v32 = vor.u32 %v4459_v29, %v3892_v24 }
 0x443   :  { %v1677_v17 = vmax.f32 %v1674_v63, 0.0  ;;  %v3833_v63 = vor.u32 %v4444_v14, %v3832_v13  ;;  %v504_v13 = vperm.slane %v5707_v11, 1  ;;  %v595_v14 = vadd.f32 %v5102_v19, %v503_v12  ;;  %v4471_v19 = vld [vmem:[#allocation2 + $0x238] sm:$0xff] }
 0x444   :  { %2112 = vmatpush.bf16.msra.mxu3 %v3893_v32  ;;  %v2208_v12 = vperm.slane %v5492_v15, 3 }
 0x445   :  { %v1694_v34 = vpack.c.bf16 %v1677_v17, %v1677_v17  ;;  %v3837_v17 = vor.u32 %v4443_v22, %v3834_v23  ;;  %2096 = vmatpush.bf16.msrb.mxu2 %v3833_v63  ;;  %v608_v18 = vadd.f32 %v5104_v20, %v504_v13  ;;  %v4470_v20 = vld [vmem:[#allocation2 + $0x230] sm:$0xff] }
 0x447   :  { %1751 = vmatmul.bf16.vlgmr.msrb.gmra.mxu3 %v1694_v34  ;;  %v3841_v34 = vor.u32 %v4445_v26, %v3840_v25  ;;  %2122 = vmatpush.bf16.msrb.mxu1 %v3837_v17 }
 0x448   :  { %v1675_v31 = vpop.f32.mrf.mxu2  ;;  %2137 = vmatpush.bf16.msrb.mxu3 %v3909_v2 }
 0x449   :  { %v3820_v31 = vld [vmem:[%s6032_s2 + $0x1e0] sm:$0xf]  ;;  %2148 = vmatpush.bf16.msrb.mxu0 %v3841_v34 }
 0x44a   :  { %v3821_v39 = vor.u32 %v4441_v35, %v3820_v31  ;;  %v1926_v35 = vperm.slane %v5492_v15, 2 }
 0x44b   :  { %2123 = vmatpush.bf16.msrb.mxu1 %v3825_v40 }
 0x44c   :  { %2097 = vmatpush.bf16.msrb.mxu2 %v3821_v39  ;;  %2138 = vmatpush.bf16.msrb.mxu3 %v3897_v9  ;;  %v4468_v39 = vld [vmem:[#allocation2 + $0x220] sm:$0xff]  ;;  %v1928_v9 = vperm.slane %v5723_v3, 2 }
 0x44d   :  { %2149 = vmatpush.bf16.msrb.mxu0 %v3829_v41 }
 0x44f   :  { %2124 = vmatpush.bf16.msrb.mxu1 %v3813_v52 }
 0x451   :  { %2150 = vmatpush.bf16.msrb.mxu0 %v3817_v53  ;;  %v4464_v53 = vld [vmem:[#allocation2 + $0x200] sm:$0xff] }
 0x453   :  { %2125 = vmatpush.bf16.msrb.mxu1 %v3801_v61  ;;  %v4478_v61 = vld [vmem:[#allocation2 + $0x270] sm:$0xff] }
 0x455   :  { %2151 = vmatpush.bf16.msrb.mxu0 %v3805_v62 }
 0x4ca   :  { %v1752_v42 = vpop.f32.mrf.mxu3 }
 0x4cb   :  { %v5640_v43 = vadd.f32 %v1752_v42, %v5324_v33  ;;  %v3809_v33 = vor.u32 %v4438_v47, %v3808_v46 }
 0x4cd   :  { %v1773_v44 = vpack.c.bf16 %v5640_v43, %v5640_v43  ;;  %2098 = vmatpush.bf16.msrb.mxu2 %v3809_v33  ;;  %v1927_v33 = vperm.slane %v5707_v11, 2 }
 0x4cf   :  { %1862 = vmatmul.bf16.vlgmr.msra.gmra.mxu1 %v1773_v44  ;;  %1875 = vmatmul.bf16.vlgmr.msra.gmra.mxu0 %v1773_v44 }
 0x4d0   :  { %2359 = vmatpush.bf16.msra.mxu1 %v4479_v58 }
 0x4d1   :  { %2099 = vmatpush.bf16.msrb.mxu2 %v3797_v57 }
 0x4d2   :  { %v1754_v45 = vpop.f32.mrf.mxu3 }
 0x4d3   :  { %v4467_v45 = vld [vmem:[#allocation2 + $0x218] sm:$0xff] }
 0x4d4   :  { %2360 = vmatpush.bf16.msra.mxu1 %v4478_v61  ;;  %v4489_v61 = vld [vmem:[%s6033_s3 + $0x144] sm:$0xf0] }
 0x4d5   :  { %2163 = vmatpush.bf16.msra.mxu2 %v3913_v6  ;;  %v4477_v6 = vld [vmem:[#allocation2 + $0x268] sm:$0xff] }
 0x4d8   :  { %2361 = vmatpush.bf16.msra.mxu1 %v4477_v6  ;;  %v4011_v6 = vld [vmem:[%s6033_s3 + $0x138] sm:$0xf0] }
 0x4d9   :  { %2164 = vmatpush.bf16.msra.mxu2 %v3901_v10 }
 0x54c   :  { %v1863_v21 = vpop.f32.mrf.mxu1  ;;  %v1876_v22 = vpop.f32.mrf.mxu0 }
 0x54d   :  { %v1880_v23 = vadd.f32 %v1863_v21, %v595_v14  ;;  %v1881_v24 = vadd.f32 %v1876_v22, %v608_v18  ;;  %v4476_v14 = vld [vmem:[#allocation2 + $0x260] sm:$0xff] }
 0x54e   :  { %2362 = vmatpush.bf16.msra.mxu1 %v4476_v14 }
 0x54f   :  { %v1882_v25 = vmax.f32 %v1880_v23, 0.0  ;;  %v1883_v26 = vmax.f32 %v1881_v24, 0.0  ;;  %v4475_v23 = vld [vmem:[#allocation2 + $0x258] sm:$0xff] }
 0x551   :  { %v1924_v29 = vpack.c.bf16 %v1882_v25, %v1882_v25  ;;  %v1925_v32 = vpack.c.bf16 %v1883_v26, %v1883_v26 }
 0x552   :  { %2363 = vmatpush.bf16.msra.mxu1 %v4475_v23  ;;  %v2231_v23 = vperm.slane %v5492_v15, 4 }
 0x553   :  { %2100 = vmatmul.bf16.vlgmr.msrb.gmra.mxu2 %v1924_v29  ;;  %3914 = vmatmul.msk.bf16.vlgmr.msra.gmra.mxu3 %vm1472_vm8, %v1925_v32 }
 0x554   :  { %2126 = vmatmul.bf16.vlgmr.msrb.gmra.mxu1 %v1924_v29  ;;  %2152 = vmatmul.bf16.vlgmr.msrb.gmra.mxu0 %v1924_v29  ;;  %v1865_v63 = vpop.f32.mrf.mxu1  ;;  %v1878_v17 = vpop.f32.mrf.mxu0 }
 0x555   :  { %2280 = vmatpush.bf16.msra.mxu3 %v4471_v19  ;;  %v4474_v63 = vld [vmem:[#allocation2 + $0x250] sm:$0xff] }
 0x556   :  { %2364 = vmatpush.bf16.msra.mxu1 %v4474_v63 }
 0x559   :  { %2281 = vmatpush.bf16.msra.mxu3 %v4470_v20 }
 0x55d   :  { %2282 = vmatpush.bf16.msra.mxu3 %v4469_v16 }
 0x561   :  { %2283 = vmatpush.bf16.msra.mxu3 %v4468_v39 }
 0x563   :  { %3915 = vmatmul.msk.bf16.vlgmr.msrb.gmra.mxu3 %vm1472_vm8, %v1925_v32  ;;  %3916 = vmatmul.msk.bf16.vlgmr.msra.gmra.mxu2 %vm1472_vm8, %v1925_v32 }
 0x565   :  { %2284 = vmatpush.bf16.msra.mxu3 %v4467_v45  ;;  %v4494_v45 = vld [vmem:[%s6033_s3 + $0x174] sm:$0xf] }
 0x569   :  { %2285 = vmatpush.bf16.msra.mxu3 %v4466_v48  ;;  %v4033_v48 = vld [vmem:[%s6033_s3 + $0x160] sm:$0xf] }
 0x56d   :  { %2286 = vmatpush.bf16.msra.mxu3 %v4465_v49 }
 0x571   :  { %2287 = vmatpush.bf16.msra.mxu3 %v4464_v53 }
 0x5d1   :  { %v2127_v34 = vpop.f32.mrf.mxu1  ;;  %v5716_v31 = vpop.f32.mrf.mxu0 }
 0x5d2   :  { %v2128_v52 = vadd.f32 %v2127_v34, %v1927_v33  ;;  %v2154_v21 = vadd.f32 %v5716_v31, %v1928_v9  ;;  %v4493_v33 = vld [vmem:[%s6033_s3 + $0x164] sm:$0xf0]  ;;  %v4001_v9 = vld [vmem:[%s6033_s3 + $0x120] sm:$0xf] }
 0x5d6   :  { %v2101_v36 = vpop.f32.mrf.mxu2  ;;  %v2114_v37 = vpop.f32.mrf.mxu3 }
 0x5d7   :  { %v2102_v38 = vadd.f32 %v2101_v36, %v1926_v35 }
 0x5d9   :  { %v2115_v40 = vadd.f32 %v2114_v37, %v2102_v38  ;;  %v2129_v41 = vpop.f32.mrf.mxu1  ;;  %v2155_v42 = vpop.f32.mrf.mxu0 }
 0x5da   :  { %v4472_v41 = vld [vmem:[#allocation2 + $0x240] sm:$0xff]  ;;  %v4041_v42 = vld [vmem:[%s6033_s3 + $0x170] sm:$0xf] }
 0x5db   :  { %v3917_v44 = vmul.f32 -1.442695, %v2115_v40  ;;  %v4473_v40 = vld [vmem:[#allocation2 + $0x248] sm:$0xff] }
 0x5dc   :  { %2365 = vmatpush.bf16.msra.mxu1 %v4473_v40  ;;  %v4517_v40 = vld [vmem:[%s6032_s2 + $0x34c] sm:$0xf] }
 0x5dd   :  { %4565 = vpow2.f32 %v3917_v44  ;;  %v4495_v44 = vld [vmem:[%s6033_s3 + $0x174] sm:$0xf0] }
 0x5de   :  { %v2103_v46 = vpop.f32.mrf.mxu2  ;;  %v2116_v47 = vpop.f32.mrf.mxu3 }
 0x5df   :  { %v4042_v46 = vor.u32 %v4495_v44, %v4041_v42  ;;  %v4043_v47 = vld [vmem:[%s6033_s3 + $0x178] sm:$0xf0]  ;;  %v4135_v42 = vld [vmem:[%s6032_s2 + $0x354] sm:$0xf0]  ;;  %v4121_v44 = vld [vmem:[%s6032_s2 + $0x330] sm:$0xf] }
 0x5e0   :  { %2366 = vmatpush.bf16.msra.mxu1 %v4472_v41  ;;  %v4046_v49 = vor.u32 %v4494_v45, %v4043_v47  ;;  %v4515_v45 = vld [vmem:[%s6032_s2 + $0x338] sm:$0xf0]  ;;  %v4514_v47 = vld [vmem:[%s6032_s2 + $0x334] sm:$0xf] }
 0x5e1   :  { %2470 = vmatpush.bf16.msrb.mxu2 %v4042_v46  ;;  %v4138_v46 = vor.u32 %v4517_v40, %v4135_v42 }
 0x5e2   :  { %2483 = vmatpush.bf16.msra.mxu0 %v4046_v49  ;;  %v4122_v49 = vor.u32 %v4515_v45, %v4121_v44  ;;  %v4093_v44 = vld [vmem:[%s6032_s2 + $0x2f0] sm:$0xf]  ;;  %v4507_v45 = vld [vmem:[%s6032_s2 + $0x2f8] sm:$0xf0] }
 0x5e3   :  { %v4566_v50 = vpop.eup %4565 }
 0x5e4   :  { %v2173_v51 = vadd.f32 1.0, %v4566_v50  ;;  %v4492_v50 = vld [vmem:[%s6033_s3 + $0x164] sm:$0xf] }
 0x5e6   :  { %4567 = vrcp.f32 %v2173_v51  ;;  %v2140_v54 = vpop.f32.mrf.mxu3  ;;  %v2166_v55 = vpop.f32.mrf.mxu2  ;;  %v2185_v1 = vand.u32 2147483648, %v2173_v51  ;;  %v2183_v5 = vand.u32 2147483647, %v2173_v51  ;;  %vm2179_vm2 = vweird.f32 %v2173_v51 }
 0x5e7   :  { %v2141_v56 = vadd.f32 %v2140_v54, %v2128_v52  ;;  %v2167_v25 = vadd.f32 %v2166_v55, %v2154_v21  ;;  %v4034_v52 = vor.u32 %v4493_v33, %v4033_v48  ;;  %v4025_v54 = vld [vmem:[%s6033_s3 + $0x150] sm:$0xf]  ;;  %v4491_v55 = vld [vmem:[%s6033_s3 + $0x154] sm:$0xf0]  ;;  %v4123_v48 = vld [vmem:[%s6032_s2 + $0x33c] sm:$0xf0] }
 0x5e8   :  { %v2186_v10 = vor.u32 1.1754944e-38, %v2185_v1  ;;  %vm2184_vm4 = vcmp.eq.f32.partialorder %v2183_v5, 8.507059e+37  ;;  %v4026_v58 = vor.u32 %v4491_v55, %v4025_v54  ;;  %v4486_v5 = vld [vmem:[%s6033_s3 + $0x134] sm:$0xf]  ;;  %v3993_v21 = vld [vmem:[%s6033_s3 + $0x110] sm:$0xf] }
 0x5e9   :  { %v3918_v57 = vmul.f32 -1.442695, %v2141_v56  ;;  %v4490_v56 = vld [vmem:[%s6033_s3 + $0x154] sm:$0xf]  ;;  %2471 = vmatpush.bf16.msrb.mxu2 %v4034_v52  ;;  %v4157_v33 = vld [vmem:[%s6032_s2 + $0x378] sm:$0xf] }
 0x5ea   :  { %v4512_v52 = vld [vmem:[%s6032_s2 + $0x320] sm:$0xf0]  ;;  %v4511_v55 = vld [vmem:[%s6032_s2 + $0x31c] sm:$0xf] }
 0x5eb   :  { %4569 = vpow2.f32 %v3918_v57  ;;  %v4027_v57 = vld [vmem:[%s6033_s3 + $0x158] sm:$0xf0] }
 0x5ec   :  { %v4568_v59 = vpop.eup %4567 }
 0x5ed   :  { %v2175_v60 = vmul.f32 %v4568_v59, %v2173_v51  ;;  %vm2180_vm1 = vweird.f32 %v4568_v59  ;;  %v4035_v51 = vld [vmem:[%s6033_s3 + $0x168] sm:$0xf0]  ;;  %2472 = vmatpush.bf16.msrb.mxu2 %v4026_v58 }
 0x5ee   :  { %v2142_v62 = vpop.f32.mrf.mxu3  ;;  %v2168_v0 = vpop.f32.mrf.mxu2  ;;  %vm2181_vm3 = vmor %vm2179_vm2, %vm2180_vm1  ;;  %v4038_v53 = vor.u32 %v4492_v50, %v4035_v51  ;;  %v4524_v50 = vld [vmem:[%s6032_s2 + $0x380] sm:$0xf0]  ;;  %v4109_v51 = vld [vmem:[%s6032_s2 + $0x318] sm:$0xf] }
 0x5ef   :  { %v2176_v30 = vsub.f32 1.0, %v2175_v60  ;;  %v4017_v60 = vld [vmem:[%s6033_s3 + $0x140] sm:$0xf]  ;;  %v4488_v62 = vld [vmem:[%s6033_s3 + $0x144] sm:$0xf]  ;;  %v4158_v54 = vor.u32 %v4524_v50, %v4157_v33 }
 0x5f0   :  { %2484 = vmatpush.bf16.msra.mxu0 %v4038_v53  ;;  %v4019_v0 = vld [vmem:[%s6033_s3 + $0x148] sm:$0xf0]  ;;  %v4126_v53 = vor.u32 %v4514_v47, %v4123_v48  ;;  %v4049_v47 = vld [vmem:[%s6032_s2 + $0x2a0] sm:$0xf]  ;;  %v4496_v33 = vld [vmem:[%s6032_s2 + $0x2a4] sm:$0xf] }
 0x5f1   :  { %v4570_v2 = vpop.eup %4569  ;;  %v2177_v4 = vmul.f32 %v4568_v59, %v2176_v30  ;;  %v4018_v30 = vor.u32 %v4489_v61, %v4017_v60  ;;  %v4022_v1 = vor.u32 %v4488_v62, %v4019_v0  ;;  %v4521_v58 = vld [vmem:[%s6032_s2 + $0x368] sm:$0xf0]  ;;  %v4519_v60 = vld [vmem:[%s6032_s2 + $0x358] sm:$0xf0]  ;;  %2727 = vmatpush.bf16.msrb.mxu1 %v4158_v54  ;;  %v4110_v62 = vor.u32 %v4512_v52, %v4109_v51  ;;  %v4051_v50 = vld [vmem:[%s6032_s2 + $0x2ac] sm:$0xf0] }
 0x5f2   :  { %v2192_v7 = vadd.f32 1.0, %v4570_v2  ;;  %v4009_v2 = vld [vmem:[%s6033_s3 + $0x130] sm:$0xf]  ;;  %v4497_v48 = vld [vmem:[%s6032_s2 + $0x2a8] sm:$0xf0]  ;;  %v4054_v51 = vor.u32 %v4496_v33, %v4051_v50 }
 0x5f3   :  { %v2178_v8 = vadd.f32 %v4568_v59, %v2177_v4  ;;  %v4487_v4 = vld [vmem:[%s6033_s3 + $0x134] sm:$0xf0]  ;;  %2473 = vmatpush.bf16.msrb.mxu2 %v4018_v30  ;;  %v4097_v30 = vld [vmem:[%s6032_s2 + $0x300] sm:$0xf] }
 0x5f4   :  { %4571 = vrcp.f32 %v2192_v7  ;;  %v2204_v17 = vand.u32 2147483648, %v2192_v7  ;;  %v2202_v20 = vand.u32 2147483647, %v2192_v7  ;;  %vm2198_vm6 = vweird.f32 %v2192_v7  ;;  %v4081_v52 = vld [vmem:[%s6032_s2 + $0x2d8] sm:$0xf] }
 0x5f5   :  { %v2182_v13 = vsel %vm2181_vm3, %v4568_v59, %v2178_v8  ;;  %v4030_v59 = vor.u32 %v4490_v56, %v4027_v57  ;;  %v4014_v8 = vor.u32 %v4486_v5, %v4011_v6  ;;  %v4111_v56 = vld [vmem:[%s6032_s2 + $0x324] sm:$0xf0]  ;;  %v4145_v57 = vld [vmem:[%s6032_s2 + $0x360] sm:$0xf]  ;;  %v4516_v5 = vld [vmem:[%s6032_s2 + $0x340] sm:$0xf0] }
 0x5f6   :  { %v2187_v18 = vsel %vm2184_vm4, %v2186_v10, %v2182_v13  ;;  %v2205_v31 = vor.u32 1.1754944e-38, %v2204_v17  ;;  %vm2203_vm9 = vcmp.eq.f32.partialorder %v2202_v20, 8.507059e+37  ;;  %v4485_v10 = vld [vmem:[%s6033_s3 + $0x124] sm:$0xf0]  ;;  %v4003_v13 = vld [vmem:[%s6033_s3 + $0x128] sm:$0xf0]  ;;  %v4146_v61 = vor.u32 %v4521_v58, %v4145_v57 }
 0x5f7   :  { %v2209_v22 = vmul.f32 %v2208_v12, %v2187_v18  ;;  %2485 = vmatpush.bf16.msra.mxu0 %v4030_v59  ;;  %v4484_v12 = vld [vmem:[%s6033_s3 + $0x124] sm:$0xf]  ;;  %v4002_v14 = vor.u32 %v4485_v10, %v4001_v9  ;;  %v4141_v59 = vld [vmem:[%s6032_s2 + $0x350] sm:$0xf]  ;;  %v4069_v58 = vld [vmem:[%s6032_s2 + $0x2c0] sm:$0xf] }
 0x5f8   :  { %v4006_v18 = vor.u32 %v4484_v12, %v4003_v13  ;;  %v4142_v0 = vor.u32 %v4519_v60, %v4141_v59  ;;  %v4508_v6 = vld [vmem:[%s6032_s2 + $0x304] sm:$0xf]  ;;  %2728 = vmatpush.bf16.msrb.mxu1 %v4146_v61  ;;  %v4085_v12 = vld [vmem:[%s6032_s2 + $0x2e8] sm:$0xf]  ;;  %v4506_v13 = vld [vmem:[%s6032_s2 + $0x2f0] sm:$0xf0] }
 0x5f9   :  { %v2210_v29 = vadd.f32 %v2209_v22, %v2167_v25  ;;  %v4483_v22 = vld [vmem:[%s6033_s3 + $0x114] sm:$0xf0]  ;;  %v3995_v25 = vld [vmem:[%s6033_s3 + $0x118] sm:$0xf0]  ;;  %v4501_v59 = vld [vmem:[%s6032_s2 + $0x2c8] sm:$0xf0] }
 0x5fa   :  { %v4572_v24 = vpop.eup %4571  ;;  %v4057_v60 = vld [vmem:[%s6032_s2 + $0x2a8] sm:$0xf]  ;;  %v4070_v61 = vor.u32 %v4501_v59, %v4069_v58 }
 0x5fb   :  { %v2194_v26 = vmul.f32 %v4572_v24, %v2192_v7  ;;  %vm2199_vm5 = vweird.f32 %v4572_v24  ;;  %4573 = vtanh.f32 %v2210_v29  ;;  %v4010_v7 = vor.u32 %v4487_v4, %v4009_v2  ;;  %2486 = vmatpush.bf16.msra.mxu0 %v4022_v1  ;;  %v4509_v2 = vld [vmem:[%s6032_s2 + $0x308] sm:$0xf0]  ;;  %v4129_v4 = vld [vmem:[%s6032_s2 + $0x338] sm:$0xf] }
 0x5fc   :  { %vm2200_vm7 = vmor %vm2198_vm6, %vm2199_vm5  ;;  %v4114_v1 = vor.u32 %v4511_v55, %v4111_v56  ;;  %v4130_v9 = vor.u32 %v4516_v5, %v4129_v4  ;;  %v4523_v55 = vld [vmem:[%s6032_s2 + $0x37c] sm:$0xf]  ;;  %v4159_v56 = vld [vmem:[%s6032_s2 + $0x384] sm:$0xf0]  ;;  %v628_v4 = vperm.slane %v5707_v11, 5 }
 0x5fd   :  { %v2195_v32 = vsub.f32 1.0, %v2194_v26  ;;  %2474 = vmatpush.bf16.msrb.mxu2 %v4010_v7  ;;  %v3994_v26 = vor.u32 %v4483_v22, %v3993_v21  ;;  %v4099_v7 = vld [vmem:[%s6032_s2 + $0x30c] sm:$0xf0]  ;;  %v4086_v21 = vor.u32 %v4506_v13, %v4085_v12  ;;  %v4162_v57 = vor.u32 %v4523_v55, %v4159_v56 }
 0x5fe   :  { %v4102_v10 = vor.u32 %v4508_v6, %v4099_v7  ;;  %v732_v5 = vadd.f32 %v5108_v28, %v628_v4  ;;  %v627_v7 = vperm.slane %v5492_v15, 5  ;;  %v4525_v28 = vld [vmem:[%s6032_s2 + $0x388] sm:$0xf0]  ;;  %v4540_v56 = vld [vmem:[#allocation2 + $0x2f0] sm:$0xff]  ;;  %v4585_v4 = vld [vmem:[%s6034_s4 + $0x18] sm:$0xff] }
 0x5ff   :  { %v2196_v19 = vmul.f32 %v4572_v24, %v2195_v32  ;;  %2487 = vmatpush.bf16.msra.mxu0 %v4014_v8  ;;  %v4098_v8 = vor.u32 %v4509_v2, %v4097_v30  ;;  %v4147_v30 = vld [vmem:[%s6032_s2 + $0x36c] sm:$0xf0] }
 0x601   :  { %v2197_v34 = vadd.f32 %v4572_v24, %v2196_v19  ;;  %v4574_v37 = vpop.eup %4573  ;;  %2475 = vmatpush.bf16.msrb.mxu2 %v4002_v14  ;;  %v4505_v14 = vld [vmem:[%s6032_s2 + $0x2ec] sm:$0xf] }
 0x603   :  { %v2201_v35 = vsel %vm2200_vm7, %v4572_v24, %v2197_v34  ;;  %v4482_v24 = vld [vmem:[%s6033_s3 + $0x114] sm:$0xf]  ;;  %2488 = vmatpush.bf16.msra.mxu0 %v4006_v18  ;;  %v3985_v34 = vld [vmem:[%s6033_s3 + $0x100] sm:$0xf]  ;;  %v4087_v18 = vld [vmem:[%s6032_s2 + $0x2f4] sm:$0xf0] }
 0x604   :  { %v2206_v16 = vsel %vm2203_vm9, %v2205_v31, %v2201_v35  ;;  %v3998_v32 = vor.u32 %v4482_v24, %v3995_v25  ;;  %v4481_v31 = vld [vmem:[%s6033_s3 + $0x104] sm:$0xf0]  ;;  %v4480_v35 = vld [vmem:[%s6033_s3 + $0x104] sm:$0xf]  ;;  %v4090_v22 = vor.u32 %v4505_v14, %v4087_v18  ;;  %v4165_v18 = vld [vmem:[%s6032_s2 + $0x380] sm:$0xf] }
 0x605   :  { %v2212_v36 = vsub.f32 1.0, %v2206_v16  ;;  %2476 = vmatpush.bf16.msrb.mxu2 %v3994_v26  ;;  %v3986_v16 = vor.u32 %v4481_v31, %v3985_v34  ;;  %v4075_v34 = vld [vmem:[%s6032_s2 + $0x2dc] sm:$0xf0] }
 0x607   :  { %v2213_v38 = vmul.f32 %v4574_v37, %v2212_v36  ;;  %2489 = vmatpush.bf16.msra.mxu0 %v3998_v32  ;;  %v3987_v36 = vld [vmem:[%s6033_s3 + $0x108] sm:$0xf0] }
 0x608   :  { %v3990_v37 = vor.u32 %v4480_v35, %v3987_v36  ;;  %v4513_v32 = vld [vmem:[%s6032_s2 + $0x328] sm:$0xf0]  ;;  %v4105_v35 = vld [vmem:[%s6032_s2 + $0x308] sm:$0xf] }
 0x609   :  { %v2230_v39 = vpack.c.bf16 %v2213_v38, %v2213_v38  ;;  %2477 = vmatpush.bf16.msrb.mxu2 %v3986_v16  ;;  %v4133_v38 = vld [vmem:[%s6032_s2 + $0x348] sm:$0xf]  ;;  %v4510_v16 = vld [vmem:[%s6032_s2 + $0x310] sm:$0xf0] }
 0x60a   :  { %v4106_v36 = vor.u32 %v4510_v16, %v4105_v35 }
 0x60b   :  { %2288 = vmatmul.bf16.vlgmr.msra.gmra.mxu3 %v2230_v39  ;;  %2490 = vmatpush.bf16.msra.mxu0 %v3990_v37  ;;  %v4518_v39 = vld [vmem:[%s6032_s2 + $0x350] sm:$0xf0]  ;;  %v4061_v37 = vld [vmem:[%s6032_s2 + $0x2b8] sm:$0xf] }
 0x60c   :  { %v4134_v41 = vor.u32 %v4518_v39, %v4133_v38  ;;  %v4500_v38 = vld [vmem:[%s6032_s2 + $0x2c0] sm:$0xf0]  ;;  %v4499_v39 = vld [vmem:[%s6032_s2 + $0x2bc] sm:$0xf] }
 0x60d   :  { %2734 = vmatpush.bf16.msra.mxu2 %v4138_v46  ;;  %v4062_v40 = vor.u32 %v4500_v38, %v4061_v37  ;;  %v4094_v46 = vor.u32 %v4507_v45, %v4093_v44  ;;  %v4528_v44 = vld [vmem:[#allocation2 + $0x290] sm:$0xff]  ;;  %v2543_v45 = vperm.slane %v5707_v11, 6 }
 0x60e   :  { %2708 = vmatpush.bf16.msrb.mxu3 %v4134_v41  ;;  %v4063_v41 = vld [vmem:[%s6032_s2 + $0x2c4] sm:$0xf0] }
 0x60f   :  { %v4066_v42 = vor.u32 %v4499_v39, %v4063_v41 }
 0x611   :  { %2735 = vmatpush.bf16.msra.mxu2 %v4126_v53  ;;  %v4504_v53 = vld [vmem:[%s6032_s2 + $0x2e0] sm:$0xf0] }
 0x612   :  { %2709 = vmatpush.bf16.msrb.mxu3 %v4122_v49  ;;  %v4050_v49 = vor.u32 %v4497_v48, %v4049_v47  ;;  %v4082_v54 = vor.u32 %v4504_v53, %v4081_v52  ;;  %v4541_v53 = vld [vmem:[#allocation2 + $0x2f8] sm:$0xff] }
 0x615   :  { %2736 = vmatpush.bf16.msra.mxu2 %v4114_v1 }
 0x616   :  { %2710 = vmatpush.bf16.msrb.mxu3 %v4110_v62  ;;  %v4498_v62 = vld [vmem:[%s6032_s2 + $0x2b0] sm:$0xf0] }
 0x617   :  { %v4058_v2 = vor.u32 %v4498_v62, %v4057_v60  ;;  %v4539_v62 = vld [vmem:[#allocation2 + $0x2e8] sm:$0xff] }
 0x619   :  { %2737 = vmatpush.bf16.msra.mxu2 %v4102_v10  ;;  %v719_v10 = vadd.f32 %v5106_v27, %v627_v7  ;;  %v4153_v27 = vld [vmem:[%s6032_s2 + $0x368] sm:$0xf]  ;;  %v4538_v7 = vld [vmem:[#allocation2 + $0x2e0] sm:$0xff] }
 0x61a   :  { %2711 = vmatpush.bf16.msrb.mxu3 %v4098_v8 }
 0x61d   :  { %2738 = vmatpush.bf16.msra.mxu2 %v4090_v22 }
 0x61e   :  { %2712 = vmatpush.bf16.msrb.mxu3 %v4086_v21 }
 0x68e   :  { %v2289_v29 = vpop.f32.mrf.mxu3 }
 0x68f   :  { %v2290_v63 = vadd.f32 %v2289_v29, %v2231_v23  ;;  %v4117_v29 = vld [vmem:[%s6032_s2 + $0x320] sm:$0xf] }
 0x691   :  { %v2293_v17 = vmax.f32 %v2290_v63, 0.0  ;;  %v4118_v63 = vor.u32 %v4513_v32, %v4117_v29 }
 0x693   :  { %v2310_v19 = vpack.c.bf16 %v2293_v17, %v2293_v17  ;;  %v4503_v17 = vld [vmem:[%s6032_s2 + $0x2d8] sm:$0xf0] }
 0x695   :  { %2367 = vmatmul.bf16.vlgmr.msra.gmra.mxu1 %v2310_v19  ;;  %v4502_v19 = vld [vmem:[%s6032_s2 + $0x2d4] sm:$0xf] }
 0x696   :  { %v2291_v20 = vpop.f32.mrf.mxu3  ;;  %2760 = vmatpush.bf16.msra.mxu1 %v4142_v0  ;;  %v4078_v31 = vor.u32 %v4502_v19, %v4075_v34  ;;  %v4520_v0 = vld [vmem:[%s6032_s2 + $0x364] sm:$0xf]  ;;  %v4531_v34 = vld [vmem:[#allocation2 + $0x2a8] sm:$0xff] }
 0x697   :  { %v4150_v1 = vor.u32 %v4520_v0, %v4147_v30  ;;  %v2544_v0 = vperm.slane %v5723_v3, 6 }
 0x698   :  { %2739 = vmatpush.bf16.msra.mxu2 %v4078_v31 }
 0x69a   :  { %2761 = vmatpush.bf16.msra.mxu1 %v4130_v9 }
 0x69c   :  { %2740 = vmatpush.bf16.msra.mxu2 %v4066_v42 }
 0x69e   :  { %2762 = vmatpush.bf16.msra.mxu1 %v4118_v63 }
 0x6a0   :  { %2741 = vmatpush.bf16.msra.mxu2 %v4054_v51 }
 0x6a2   :  { %2763 = vmatpush.bf16.msra.mxu1 %v4106_v36  ;;  %v4530_v36 = vld [vmem:[#allocation2 + $0x2a0] sm:$0xff] }
 0x6a6   :  { %2764 = vmatpush.bf16.msra.mxu1 %v4094_v46 }
 0x6aa   :  { %2765 = vmatpush.bf16.msra.mxu1 %v4082_v54 }
 0x6ae   :  { %2766 = vmatpush.bf16.msra.mxu1 %v4070_v61 }
 0x6b2   :  { %2767 = vmatpush.bf16.msra.mxu1 %v4058_v2 }
 0x712   :  { %v2368_v23 = vpop.f32.mrf.mxu1 }
 0x713   :  { %v5910_v24 = vadd.f32 %v2368_v23, %v5640_v43  ;;  %v4073_v43 = vld [vmem:[%s6032_s2 + $0x2d0] sm:$0xf]  ;;  %v4166_v23 = vor.u32 %v4525_v28, %v4165_v18 }
 0x714   :  { %v4074_v20 = vor.u32 %v4503_v17, %v4073_v43  ;;  %v4533_v43 = vld [vmem:[#allocation2 + $0x2b8] sm:$0xff]  ;;  %v4532_v17 = vld [vmem:[#allocation2 + $0x2b0] sm:$0xff] }
 0x715   :  { %v2389_v25 = vpack.c.bf16 %v5910_v24, %v5910_v24  ;;  %2896 = vmatpush.bf16.msrb.mxu0 %v4533_v43 }
 0x716   :  { %2713 = vmatpush.bf16.msrb.mxu3 %v4074_v20  ;;  %v2542_v20 = vperm.slane %v5492_v15, 6  ;;  %v4527_v15 = vld [vmem:[#allocation2 + $0x288] sm:$0xff] }
 0x717   :  { %2478 = vmatmul.bf16.vlgmr.msrb.gmra.mxu2 %v2389_v25  ;;  %2491 = vmatmul.bf16.vlgmr.msra.gmra.mxu0 %v2389_v25 }
 0x718   :  { %2975 = vmatpush.bf16.msrb.mxu2 %v4541_v53 }
 0x719   :  { %2897 = vmatpush.bf16.msrb.mxu0 %v4532_v17 }
 0x71a   :  { %v2370_v26 = vpop.f32.mrf.mxu1  ;;  %2714 = vmatpush.bf16.msrb.mxu3 %v4062_v40  ;;  %v4529_v40 = vld [vmem:[#allocation2 + $0x298] sm:$0xff] }
 0x71b   :  { %v4522_v26 = vld [vmem:[%s6032_s2 + $0x370] sm:$0xf0] }
 0x71c   :  { %v4154_v32 = vor.u32 %v4522_v26, %v4153_v27  ;;  %2976 = vmatpush.bf16.msrb.mxu2 %v4540_v56 }
 0x71d   :  { %2898 = vmatpush.bf16.msrb.mxu0 %v4531_v34 }
 0x71e   :  { %2715 = vmatpush.bf16.msrb.mxu3 %v4050_v49  ;;  %v4526_v49 = vld [vmem:[#allocation2 + $0x280] sm:$0xff] }
 0x720   :  { %2977 = vmatpush.bf16.msrb.mxu2 %v4539_v62 }
 0x721   :  { %2899 = vmatpush.bf16.msrb.mxu0 %v4530_v36 }
 0x722   :  { %2753 = vmatpush.bf16.msra.mxu3 %v4162_v57 }
 0x724   :  { %2978 = vmatpush.bf16.msrb.mxu2 %v4538_v7 }
 0x725   :  { %2900 = vmatpush.bf16.msrb.mxu0 %v4529_v40 }
 0x726   :  { %2754 = vmatpush.bf16.msra.mxu3 %v4150_v1 }
 0x729   :  { %2901 = vmatpush.bf16.msrb.mxu0 %v4528_v44 }
 0x72d   :  { %2902 = vmatpush.bf16.msrb.mxu0 %v4527_v15 }
 0x731   :  { %2903 = vmatpush.bf16.msrb.mxu0 %v4526_v49 }
 0x794   :  { %v2492_v6 = vpop.f32.mrf.mxu0 }
 0x795   :  { %v2497_v8 = vadd.f32 %v2492_v6, %v732_v5  ;;  %v2824_v5 = vperm.slane %v4585_v4, 7 }
 0x797   :  { %v2499_v9 = vmax.f32 %v2497_v8, 0.0 }
 0x799   :  { %v2541_v12 = vpack.c.bf16 %v2499_v9, %v2499_v9 }
 0x79a   :  { %v2479_v13 = vpop.f32.mrf.mxu2 }
 0x79b   :  { %v2496_v14 = vadd.f32 %v2479_v13, %v719_v10  ;;  %4167 = vmatmul.msk.bf16.vlgmr.msrb.gmra.mxu1 %vm1472_vm8, %v2541_v12  ;;  %v4537_v13 = vld [vmem:[#allocation2 + $0x2d8] sm:$0xff] }
 0x79c   :  { %v2494_v21 = vpop.f32.mrf.mxu0  ;;  %2979 = vmatpush.bf16.msrb.mxu2 %v4537_v13 }
 0x79d   :  { %v2498_v22 = vmax.f32 %v2496_v14, 0.0 }
 0x79f   :  { %v2540_v25 = vpack.c.bf16 %v2498_v22, %v2498_v22  ;;  %v4536_v22 = vld [vmem:[#allocation2 + $0x2d0] sm:$0xff] }
 0x7a0   :  { %2980 = vmatpush.bf16.msrb.mxu2 %v4536_v22 }
 0x7a1   :  { %2716 = vmatmul.bf16.vlgmr.msrb.gmra.mxu3 %v2540_v25  ;;  %2742 = vmatmul.bf16.vlgmr.msra.gmra.mxu2 %v2540_v25 }
 0x7a2   :  { %v2481_v29 = vpop.f32.mrf.mxu2  ;;  %2779 = vmatpush.bf16.msrb.mxu3 %v4166_v23 }
 0x7a6   :  { %2780 = vmatpush.bf16.msrb.mxu3 %v4154_v32 }
 0x7ab   :  { %2768 = vmatmul.bf16.vlgmr.msra.gmra.mxu1 %v2540_v25 }
 0x7b1   :  { %4168 = vmatmul.msk.bf16.vlgmr.msra.gmra.mxu3 %vm1472_vm8, %v2541_v12 }
 0x7c1   :  { %4169 = vmatmul.msk.bf16.vlgmr.msrb.gmra.mxu3 %vm1472_vm8, %v2541_v12 }
 0x818   :  { %v2730_v63 = vpop.f32.mrf.mxu1 }
 0x820   :  { %v2732_v19 = vpop.f32.mrf.mxu1 }
 0x824   :  { %v2717_v31 = vpop.f32.mrf.mxu3  ;;  %v2743_v35 = vpop.f32.mrf.mxu2 }
 0x825   :  { %v2718_v16 = vadd.f32 %v2717_v31, %v2542_v20  ;;  %v2744_v33 = vadd.f32 %v2743_v35, %v2543_v45  ;;  %v4535_v31 = vld [vmem:[#allocation2 + $0x2c8] sm:$0xff]  ;;  %v4534_v35 = vld [vmem:[#allocation2 + $0x2c0] sm:$0xff] }
 0x826   :  { %2981 = vmatpush.bf16.msrb.mxu2 %v4535_v31 }
 0x827   :  { %v2731_v37 = vadd.f32 %v2730_v63, %v2718_v16  ;;  %v43_v16 = vld [vmem:[%s6034_s4 + $0x30] sm:$0xff] }
 0x828   :  { %v2769_v38 = vpop.f32.mrf.mxu1  ;;  %v2847_v36 = vperm.slane %v43_v16, 0 }
 0x829   :  { %v4170_v39 = vmul.f32 -1.442695, %v2731_v37  ;;  %v2770_v8 = vadd.f32 %v2769_v38, %v2544_v0 }
 0x82a   :  { %2982 = vmatpush.bf16.msrb.mxu2 %v4534_v35 }
 0x82b   :  { %4575 = vpow2.f32 %v4170_v39 }
 0x82c   :  { %v2719_v41 = vpop.f32.mrf.mxu3  ;;  %v2745_v42 = vpop.f32.mrf.mxu2 }
 0x830   :  { %v2771_v46 = vpop.f32.mrf.mxu1 }
 0x831   :  { %v4576_v47 = vpop.eup %4575 }
 0x832   :  { %v2789_v48 = vadd.f32 1.0, %v4576_v47 }
 0x834   :  { %4577 = vrcp.f32 %v2789_v48  ;;  %v2756_v50 = vpop.f32.mrf.mxu3  ;;  %v2801_v58 = vand.u32 2147483648, %v2789_v48  ;;  %v2799_v61 = vand.u32 2147483647, %v2789_v48  ;;  %vm2795_vm10 = vweird.f32 %v2789_v48 }
 0x835   :  { %v2757_v51 = vadd.f32 %v2756_v50, %v2744_v33 }
 0x836   :  { %v2802_v2 = vor.u32 1.1754944e-38, %v2801_v58  ;;  %vm2800_vm12 = vcmp.eq.f32.partialorder %v2799_v61, 8.507059e+37 }
 0x837   :  { %v4171_v52 = vmul.f32 -1.442695, %v2757_v51 }
 0x839   :  { %4579 = vpow2.f32 %v4171_v52 }
 0x83a   :  { %v4578_v54 = vpop.eup %4577 }
 0x83b   :  { %v2791_v55 = vmul.f32 %v4578_v54, %v2789_v48  ;;  %vm2796_vm8 = vweird.f32 %v4578_v54 }
 0x83c   :  { %v2758_v11 = vpop.f32.mrf.mxu3  ;;  %vm2797_vm11 = vmor %vm2795_vm10, %vm2796_vm8 }
 0x83d   :  { %v2792_v57 = vsub.f32 1.0, %v2791_v55 }
 0x83f   :  { %v4580_v59 = vpop.eup %4579  ;;  %v2793_v60 = vmul.f32 %v4578_v54, %v2792_v57 }
 0x840   :  { %v2808_v30 = vadd.f32 1.0, %v4580_v59 }
 0x841   :  { %v2794_v1 = vadd.f32 %v4578_v54, %v2793_v60 }
 0x842   :  { %4581 = vrcp.f32 %v2808_v30  ;;  %v2820_v25 = vand.u32 2147483648, %v2808_v30  ;;  %v2818_v26 = vand.u32 2147483647, %v2808_v30  ;;  %vm2814_vm14 = vweird.f32 %v2808_v30 }
 0x843   :  { %v2798_v6 = vsel %vm2797_vm11, %v4578_v54, %v2794_v1 }
 0x844   :  { %v2782_v9 = vpop.f32.mrf.mxu3  ;;  %v2803_v10 = vsel %vm2800_vm12, %v2802_v2, %v2798_v6  ;;  %v2821_v32 = vor.u32 1.1754944e-38, %v2820_v25  ;;  %vm2819_vm0 = vcmp.eq.f32.partialorder %v2818_v26, 8.507059e+37 }
 0x845   :  { %v2783_v12 = vadd.f32 %v2782_v9, %v2770_v8  ;;  %v2825_v3 = vmul.f32 %v2824_v5, %v2803_v10 }
 0x847   :  { %v2826_v28 = vadd.f32 %v2825_v3, %v2783_v12 }
 0x848   :  { %v4582_v14 = vpop.eup %4581 }
 0x849   :  { %v2810_v18 = vmul.f32 %v4582_v14, %v2808_v30  ;;  %vm2815_vm13 = vweird.f32 %v4582_v14  ;;  %4583 = vtanh.f32 %v2826_v28 }
 0x84a   :  { %vm2816_vm15 = vmor %vm2814_vm14, %vm2815_vm13 }
 0x84b   :  { %v2811_v21 = vsub.f32 1.0, %v2810_v18 }
 0x84c   :  { %v2784_v23 = vpop.f32.mrf.mxu3 }
 0x84d   :  { %v2812_v27 = vmul.f32 %v4582_v14, %v2811_v21 }
 0x84f   :  { %v2813_v29 = vadd.f32 %v4582_v14, %v2812_v27  ;;  %v4584_v19 = vpop.eup %4583 }
 0x851   :  { %v2817_v63 = vsel %vm2816_vm15, %v4582_v14, %v2813_v29 }
 0x852   :  { %v2822_v43 = vsel %vm2819_vm0, %v2821_v32, %v2817_v63 }
 0x853   :  { %v2828_v17 = vsub.f32 1.0, %v2822_v43 }
 0x855   :  { %v2829_v20 = vmul.f32 %v4584_v19, %v2828_v17 }
 0x857   :  { %v2846_v34 = vpack.c.bf16 %v2829_v20, %v2829_v20 }
 0x859   :  { %2904 = vmatmul.bf16.vlgmr.msrb.gmra.mxu0 %v2846_v34 }
 0x8d6   :  { %v2905_v37 = vpop.f32.mrf.mxu0 }
 0x8d7   :  { %v2906_v38 = vadd.f32 %v2905_v37, %v2847_v36 }
 0x8d9   :  { %v2909_v39 = vmax.f32 %v2906_v38, 0.0 }
 0x8db   :  { %v2926_v40 = vpack.c.bf16 %v2909_v39, %v2909_v39 }
 0x8dd   :  { %2983 = vmatmul.bf16.vlgmr.msrb.gmra.mxu2 %v2926_v40 }
 0x8de   :  { %v2907_v41 = vpop.f32.mrf.mxu0 }
 0x960   :  { %v2984_v42 = vpop.f32.mrf.mxu2 }
 0x961   :  { %v2988_v44 = vadd.f32 %v2984_v42, %v5910_v24 }
 0x963   :  { %2989 = vst [vmem:[%s6035_s5] sm:$0xff] %v2988_v44 }
 0x968   :  { %v2986_v45 = vpop.f32.mrf.mxu2 }
 0x969   :  { %2994 = vsyncpa [#allocation3], 1 }

</bundles_post_ra>
